<compile_context>
chip_gen: v5e
topology: v5e:2x2
jax: 0.10.0
libtpu: 0.0.40
codegen_flags: <defaults>
</compile_context>

<pallas_src>
import math
from functools import partial

import jax
import jax.numpy as jnp
from jax.experimental import pallas as pl

# --------------------------- small, module-consistent config ---------------------------
CFG = dict(
    vocab_size=64,
    embedding_dim=32,
    num_heads=4,
    num_layers=2,
    mlp_num_layers=2,
    mlp_hidden_dim=64,
    t5_num_buckets=8,
    t5_max_distance=16,
    normalize_keys=True,
    layernorm_epsilon=1e-6,
)
EPS_LN = CFG["layernorm_epsilon"]
EPS_KQ = 1e-6          # epsilon used by QKVLayer._normalize_kq
NEG_MASK = -1000000.0  # reference causal-mask fill value (applied AFTER the attn scale)


def _rms(x, eps):
    # AGLayerNorm without the weight (weight is folded into the following matmul in glue).
    return x * jax.lax.rsqrt(jnp.mean(x * x, axis=-1, keepdims=True) + eps)


# ------------------------------- fused whole-forward kernel ----------------------------
def decoder_kernel(x_ref, wqkv_ref, qkscale_ref, wpost_ref, w1_ref, w2_ref,
                   bias_ref, bones2_ref, expand_ref, combine_ref, htab_ref,
                   pmask_ref, embT_ref, o_ref, *, num_layers, d_model):
    D = d_model

    x = x_ref[...]                 # (B*S, D)      activations, batch folded into sublanes
    bones2 = bones2_ref[...]       # (2D, 2D)      block-diag ones: per-head sum-sq for q|k
    expand = expand_ref[...]       # (B*H*S, B*S)  0/1 row-replication matrix (q head expand)
    combine = combine_ref[...]     # (B*S, B*H*S)  0/1 head-recombination matrix (= expand.T)
    htab = htab_ref[...]           # (B*H*S, D)    row (b,h,s): ones on head-h lanes
    pmask = pmask_ref[...]         # (B*H*S, B*S)  exact post-softmax causal/cross-batch mask

    for l in range(num_layers):    # static unroll: whole stack in one launch
        # ---- pre-attention AGLayerNorm (weight folded into wqkv) + fused QKV matmul ----
        xln = _rms(x, EPS_LN)
        qkv = jnp.dot(xln, wqkv_ref[l], preferred_element_type=jnp.float32)    # (BS, 3D)
        qk = qkv[:, 0:2 * D]
        v = qkv[:, 2 * D:3 * D]

        # ---- merged per-head q/k normalization (one matmul, one rsqrt, one scale mul) ----
        ss = jnp.dot(qk * qk, bones2, preferred_element_type=jnp.float32)      # (BS, 2D)
        qkn = qk * jax.lax.rsqrt(ss + EPS_KQ) * qkscale_ref[l:l + 1, :]        # [q*scale | k]
        qn = qkn[:, 0:D]
        kn = qkn[:, D:2 * D]

        # ---- head-expanded queries: one selection matmul + one mask multiply ----
        qbig = jnp.dot(expand, qn, preferred_element_type=jnp.float32) * htab  # (BHS, D)

        # ---- one logits matmul for all batches & heads ----
        logits = jax.lax.dot_general(qbig, kn, (((1,), (1,)), ((), ())),
                                     preferred_element_type=jnp.float32)       # (BHS, BS)
        logits = logits + bias_ref[l]          # T5 bias*scale; causal/cross-batch -1e6 baked in
        lmax = jnp.max(logits, axis=-1, keepdims=True)
        e = jnp.exp(logits - lmax)
        p = e * pl.reciprocal(jnp.sum(e, axis=-1, keepdims=True), approx=True)
        p = p * pmask                           # exact zeros (reference post-softmax mask)

        # ---- one weighted-values matmul; heads recombined with one selection matmul ----
        obig = jnp.dot(p, v, preferred_element_type=jnp.float32)               # (BHS, D)
        yattn = jnp.dot(combine, obig * htab, preferred_element_type=jnp.float32)  # (BS, D)

        # ---- post-attention projection + residual ----
        y = jnp.dot(yattn, wpost_ref[l], preferred_element_type=jnp.float32) + x

        # ---- FFN (Linear -> ReLU -> Linear, no bias; ln2 folded into w1) + residual ----
        yln = _rms(y, EPS_LN)
        hdn = jnp.maximum(jnp.dot(yln, w1_ref[l], preferred_element_type=jnp.float32), 0.0)
        x = jnp.dot(hdn, w2_ref[l], preferred_element_type=jnp.float32) + y

    # ---- final AGLayerNorm + tied-embedding logits (final_ln & 1/sqrt(V) folded, padded) ----
    xln = _rms(x, EPS_LN)
    o_ref[...] = jnp.dot(xln, embT_ref[...], preferred_element_type=jnp.float32)  # (BS, 128)


# ------------------------------------ shared helpers ------------------------------------
def _t5_buckets(S, NB, MD):
    ctx = jnp.arange(S, dtype=jnp.int32)[:, None]
    mem = jnp.arange(S, dtype=jnp.int32)[None, :]
    rel = mem - ctx
    rp = -jnp.minimum(rel, 0)
    max_exact = NB // 2
    is_small = rp < max_exact
    rp_f = jnp.maximum(rp.astype(jnp.float32), 1.0)          # avoid log(0); branch is masked
    rp_large = max_exact + (jnp.log(rp_f / max_exact) / math.log(MD / max_exact)
                            * (NB - max_exact)).astype(jnp.int32)
    rp_large = jnp.minimum(rp_large, NB - 1)
    return jnp.where(is_small, rp, rp_large)                 # (S, S) int32


# ------------------------------------ JAX glue ------------------------------------------
def decoder_forward(tokens, params):
    B, S = tokens.shape
    D = CFG["embedding_dim"]
    H = CFG["num_heads"]
    Dh = D // H
    L = CFG["num_layers"]
    V = CFG["vocab_size"]
    NB, MD = CFG["t5_num_buckets"], CFG["t5_max_distance"]
    VPAD = max(128, ((V + 127) // 128) * 128)                 # lane-dense output width

    # token embedding gather (glue; no hot-path Pallas equivalent at this size)
    x = params["embedding"][tokens.reshape(-1)]               # (B*S, D) fp32

    # ---- T5 relative-position buckets + per-layer fused attention bias table ----
    buckets = _t5_buckets(S, NB, MD)                          # (S, S)
    rel = jnp.arange(S, dtype=jnp.int32)[None, :] - jnp.arange(S, dtype=jnp.int32)[:, None]
    causal = rel < 0                                          # strictly-past (k < q)
    same_b = jnp.eye(B, dtype=jnp.bool_)[:, None, None, :, None]      # (B,1,1,B,1)

    bias_layers = []
    for l in range(L):
        vals = params["rel_emb"][l][buckets]                  # (S, S, H) gather
        vals = jnp.transpose(vals, (2, 0, 1)) * params["scale"][l][:, None, None]   # (H,S,S)
        vals = jnp.where(causal[None], vals, NEG_MASK)        # fill NOT scaled (matches torch)
        big = jnp.where(same_b, vals[None, :, :, None, :], NEG_MASK)   # (B,H,S,B,S)
        bias_layers.append(big.reshape(B * H * S, B * S))
    bias_all = jnp.stack(bias_layers)                         # (L, B*H*S, B*S)

    pmask = jnp.logical_and(same_b, causal[None, None, :, None, :])
    pmask = jnp.broadcast_to(pmask, (B, H, S, B, S)).reshape(B * H * S, B * S)
    pmask = pmask.astype(jnp.float32)

    # ---- selection matrices / mask tables (replace per-(b,h) slice/concat loops) ----
    rows = jnp.arange(B * H * S)
    b_of, h_of, s_of = rows // (H * S), (rows // S) % H, rows % S
    cols = b_of * S + s_of
    expand = (cols[:, None] == jnp.arange(B * S)[None, :]).astype(jnp.float32)   # (BHS, BS)
    combine = expand.T                                                           # (BS, BHS)
    head_ids = jnp.arange(D) // Dh
    htab = (head_ids[None, :] == h_of[:, None]).astype(jnp.float32)              # (BHS, D)
    g2 = jnp.arange(2 * D) // Dh
    bones2 = (g2[:, None] == g2[None, :]).astype(jnp.float32)                    # (2D, 2D)

    # per-lane [q-scale | ones] vector (attention scale folded into normalized queries)
    qkscale = jnp.concatenate(
        [jnp.repeat(params["scale"], Dh, axis=1), jnp.ones((L, D), jnp.float32)], axis=1)

    # ---- fold per-lane layernorm weights / output scale into the following matmuls ----
    wqkv_f = params["ln1"][:, :, None] * params["wqkv"]                          # (L, D, 3D)
    w1_f = params["ln2"][:, :, None] * params["w1"]                              # (L, D, Hid)
    embT_core = (params["final_ln"][:, None] * params["embedding"].T) / math.sqrt(V)
    embT_pad = jnp.zeros((D, VPAD), jnp.float32).at[:, :V].set(embT_core)        # lane-dense

    kernel = partial(decoder_kernel, num_layers=L, d_model=D)
    out = pl.pallas_call(
        kernel,
        out_shape=jax.ShapeDtypeStruct((B * S, VPAD), jnp.float32),
    )(x, wqkv_f, qkscale, params["wpost"], w1_f, params["w2"],
      bias_all, bones2, expand, combine, htab, pmask, embT_pad)
    # TODO(synk): on v7x a grid=(B,) with dimension_semantics=("parallel",) could use the
    # 2nd TensorCore; gridless single call is strictly better on single-TC v5e/v6e.
    return out[:, :V].reshape(B, S, V)


# ------------------------------- pure-JAX reference ------------------------------------
def reference_forward(tokens, params):
    B, S = tokens.shape
    D, H = CFG["embedding_dim"], CFG["num_heads"]
    Dh, L, V = D // H, CFG["num_layers"], CFG["vocab_size"]
    NB, MD = CFG["t5_num_buckets"], CFG["t5_max_distance"]

    x = params["embedding"][tokens]                                   # (B, S, D)
    causal = (jnp.arange(S)[None, :] - jnp.arange(S)[:, None]) < 0    # (S, S)
    buckets = _t5_buckets(S, NB, MD)
    for l in range(L):
        xln = x * jax.lax.rsqrt(jnp.mean(x * x, -1, keepdims=True) + EPS_LN) * params["ln1"][l]
        qkv = xln @ params["wqkv"][l]
        q, k, v = (t.reshape(B, S, H, Dh) for t in
                   (qkv[..., :D], qkv[..., D:2 * D], qkv[..., 2 * D:]))
        q = q * jax.lax.rsqrt(jnp.sum(q * q, -1, keepdims=True) + EPS_KQ)
        k = k * jax.lax.rsqrt(jnp.sum(k * k, -1, keepdims=True) + EPS_KQ)
        bias = jnp.transpose(params["rel_emb"][l][buckets], (2, 0, 1))[None]     # (1,H,S,S)
        attn = jnp.einsum('bqhd,bkhd->bhqk', q, k) + bias
        attn = attn * params["scale"][l][None, :, None, None]
        attn = jnp.where(causal[None, None], attn, NEG_MASK)
        attn = jax.nn.softmax(attn, axis=-1) * causal[None, None]
        yh = jnp.einsum('bhqk,bkhd->bqhd', attn, v).reshape(B, S, D)
        y = yh @ params["wpost"][l] + x
        yln = y * jax.lax.rsqrt(jnp.mean(y * y, -1, keepdims=True) + EPS_LN) * params["ln2"][l]
        x = jnp.maximum(yln @ params["w1"][l], 0.0) @ params["w2"][l] + y
    xln = x * jax.lax.rsqrt(jnp.mean(x * x, -1, keepdims=True) + EPS_LN) * params["final_ln"]
    return (xln @ params["embedding"].T) / math.sqrt(V)


# ----------------------------- deterministic parameter init ----------------------------
def init_params(key):
    D, V = CFG["embedding_dim"], CFG["vocab_size"]
    H, Hid = CFG["num_heads"], CFG["mlp_hidden_dim"]
    NB, L = CFG["t5_num_buckets"], CFG["num_layers"]
    keys = jax.random.split(key, 1 + L)

    def lin(k, din, dout, scale=0.05):
        # PyTorch Linear weight is (out, in); pre-transpose to (in, out) for y = x @ W.
        return (scale * jax.random.normal(k, (dout, din), jnp.float32)).T

    emb = 0.02 * jax.random.normal(keys[0], (V, D), jnp.float32)
    wqkv, wpost, w1, w2, rel = [], [], [], [], []
    for li in range(L):
        lk = jax.random.split(keys[1 + li], 7)
        wq, wk, wv = lin(lk[0], D, D), lin(lk[1], D, D), lin(lk[2], D, D)
        wqkv.append(jnp.concatenate([wq, wk, wv], axis=1))        # fused (D, 3D)
        rel.append(0.05 * jax.random.normal(lk[3], (NB, H), jnp.float32))
        wpost.append(lin(lk[4], D, D))
        w1.append(lin(lk[5], D, Hid))
        w2.append(lin(lk[6], Hid, D))

    return dict(
        embedding=emb,                                 # (V, D) fp32, never downcast
        final_ln=jnp.ones((D,), jnp.float32),
        ln1=jnp.ones((L, D), jnp.float32),
        ln2=jnp.ones((L, D), jnp.float32),
        scale=jnp.ones((L, H), jnp.float32),           # attention_scale_factors
        rel_emb=jnp.stack(rel),                        # (L, NB, H)
        wqkv=jnp.stack(wqkv),                          # (L, D, 3D)
        wpost=jnp.stack(wpost),                        # (L, D, D)
        w1=jnp.stack(w1),                              # (L, D, Hid)
        w2=jnp.stack(w2),                              # (L, Hid, D)
    )


if __name__ == "__main__":
    key = jax.random.PRNGKey(0)
    pkey, tkey = jax.random.split(key)
    params = init_params(pkey)

    batch, seq = 2, 8
    tokens = jax.random.randint(tkey, (batch, seq), 0, CFG["vocab_size"], dtype=jnp.int32)

    forward = jax.jit(decoder_forward)
    logits = forward(tokens, params)
    jax.block_until_ready(logits)
    assert logits.shape == (batch, seq, CFG["vocab_size"])
    assert logits.dtype == jnp.float32

    # reference-tolerance gate (covers approx reciprocal + folded-scale numerics)
    ref = jax.block_until_ready(jax.jit(reference_forward)(tokens, params))
    err = float(jnp.max(jnp.abs(logits - ref)))
    bound = 1e-3 + 1e-2 * float(jnp.max(jnp.abs(ref)))
    assert err <= bound, f"kernel/reference mismatch: max|diff|={err} > {bound}"
    print("KERNEL_OK")
</pallas_src>

<mosaic_0001>
module attributes {stable_mosaic.version = 11 : i64} {
  func.func @decoder_kernel(%arg0: memref<16x32xf32, #tpu.memory_space<vmem>>, %arg1: memref<2x32x96xf32, #tpu.memory_space<vmem>>, %arg2: memref<2x64xf32, #tpu.memory_space<vmem>>, %arg3: memref<2x32x32xf32, #tpu.memory_space<vmem>>, %arg4: memref<2x32x64xf32, #tpu.memory_space<vmem>>, %arg5: memref<2x64x32xf32, #tpu.memory_space<vmem>>, %arg6: memref<2x64x16xf32, #tpu.memory_space<vmem>>, %arg7: memref<64x64xf32, #tpu.memory_space<vmem>>, %arg8: memref<64x16xf32, #tpu.memory_space<vmem>>, %arg9: memref<16x64xf32, #tpu.memory_space<vmem>>, %arg10: memref<64x32xf32, #tpu.memory_space<vmem>>, %arg11: memref<64x16xf32, #tpu.memory_space<vmem>>, %arg12: memref<32x128xf32, #tpu.memory_space<vmem>>, %arg13: memref<16x128xf32, #tpu.memory_space<vmem>>) attributes {dimension_semantics = [], scalar_prefetch = 0 : i64, scratch_operands = 0 : i64, tpu.core_type = #tpu.core_type<tc>} {
    %c0 = arith.constant 0 : index
    %c0_0 = arith.constant 0 : index
    %0 = vector.load %arg0[%c0, %c0_0] : memref<16x32xf32, #tpu.memory_space<vmem>>, vector<16x32xf32>
    %c0_1 = arith.constant 0 : index
    %c0_2 = arith.constant 0 : index
    %1 = vector.load %arg7[%c0_1, %c0_2] : memref<64x64xf32, #tpu.memory_space<vmem>>, vector<64x64xf32>
    %c0_3 = arith.constant 0 : index
    %c0_4 = arith.constant 0 : index
    %2 = vector.load %arg8[%c0_3, %c0_4] : memref<64x16xf32, #tpu.memory_space<vmem>>, vector<64x16xf32>
    %c0_5 = arith.constant 0 : index
    %c0_6 = arith.constant 0 : index
    %3 = vector.load %arg9[%c0_5, %c0_6] : memref<16x64xf32, #tpu.memory_space<vmem>>, vector<16x64xf32>
    %c0_7 = arith.constant 0 : index
    %c0_8 = arith.constant 0 : index
    %4 = vector.load %arg10[%c0_7, %c0_8] : memref<64x32xf32, #tpu.memory_space<vmem>>, vector<64x32xf32>
    %c0_9 = arith.constant 0 : index
    %c0_10 = arith.constant 0 : index
    %5 = vector.load %arg11[%c0_9, %c0_10] : memref<64x16xf32, #tpu.memory_space<vmem>>, vector<64x16xf32>
    %6 = arith.mulf %0, %0 : vector<16x32xf32>
    %cst = arith.constant dense<0.000000e+00> : vector<16xf32>
    %7 = vector.multi_reduction <add>, %6, %cst [1] : vector<16x32xf32> to vector<16xf32>
    %8 = vector.shape_cast %7 : vector<16xf32> to vector<16x1xf32>
    %cst_11 = arith.constant 3.200000e+01 : f32
    %9 = vector.broadcast %cst_11 : f32 to vector<16x1xf32>
    %10 = arith.divf %8, %9 : vector<16x1xf32>
    %cst_12 = arith.constant 9.99999997E-7 : f32
    %11 = vector.broadcast %cst_12 : f32 to vector<16x1xf32>
    %12 = arith.addf %10, %11 : vector<16x1xf32>
    %13 = math.rsqrt %12 : vector<16x1xf32>
    %14 = vector.broadcast %13 : vector<16x1xf32> to vector<16x32xf32>
    %15 = arith.mulf %0, %14 : vector<16x32xf32>
    %c0_13 = arith.constant 0 : index
    %c0_14 = arith.constant 0 : index
    %c0_15 = arith.constant 0 : index
    %16 = vector.load %arg1[%c0_13, %c0_14, %c0_15] : memref<2x32x96xf32, #tpu.memory_space<vmem>>, vector<1x32x96xf32>
    %17 = vector.shape_cast %16 : vector<1x32x96xf32> to vector<32x96xf32>
    %cst_16 = arith.constant dense<0.000000e+00> : vector<16x96xf32>
    %18 = tpu.matmul %15, %17, %cst_16 {dimension_numbers = #tpu.dot_dimension_numbers<[1], [0], [0], [1], [0, 0, 1, 1], [], []>} : vector<16x32xf32>, vector<32x96xf32>, vector<16x96xf32> -> vector<16x96xf32>
    %19 = vector.extract_strided_slice %18 {offsets = [0, 0], sizes = [16, 64], strides = [1, 1]} : vector<16x96xf32> to vector<16x64xf32>
    %20 = vector.extract_strided_slice %18 {offsets = [0, 64], sizes = [16, 32], strides = [1, 1]} : vector<16x96xf32> to vector<16x32xf32>
    %21 = arith.mulf %19, %19 : vector<16x64xf32>
    %cst_17 = arith.constant dense<0.000000e+00> : vector<16x64xf32>
    %22 = tpu.matmul %21, %1, %cst_17 {dimension_numbers = #tpu.dot_dimension_numbers<[1], [0], [0], [1], [0, 0, 1, 1], [], []>} : vector<16x64xf32>, vector<64x64xf32>, vector<16x64xf32> -> vector<16x64xf32>
    %cst_18 = arith.constant 9.99999997E-7 : f32
    %23 = vector.broadcast %cst_18 : f32 to vector<16x64xf32>
    %24 = arith.addf %22, %23 : vector<16x64xf32>
    %25 = math.rsqrt %24 : vector<16x64xf32>
    %26 = arith.mulf %19, %25 : vector<16x64xf32>
    %c0_19 = arith.constant 0 : index
    %c0_20 = arith.constant 0 : index
    %27 = vector.load %arg2[%c0_19, %c0_20] : memref<2x64xf32, #tpu.memory_space<vmem>>, vector<1x64xf32>
    %28 = vector.broadcast %27 : vector<1x64xf32> to vector<16x64xf32>
    %29 = arith.mulf %26, %28 : vector<16x64xf32>
    %30 = vector.extract_strided_slice %29 {offsets = [0, 0], sizes = [16, 32], strides = [1, 1]} : vector<16x64xf32> to vector<16x32xf32>
    %31 = vector.extract_strided_slice %29 {offsets = [0, 32], sizes = [16, 32], strides = [1, 1]} : vector<16x64xf32> to vector<16x32xf32>
    %cst_21 = arith.constant dense<0.000000e+00> : vector<64x32xf32>
    %32 = tpu.matmul %2, %30, %cst_21 {dimension_numbers = #tpu.dot_dimension_numbers<[1], [0], [0], [1], [0, 0, 1, 1], [], []>} : vector<64x16xf32>, vector<16x32xf32>, vector<64x32xf32> -> vector<64x32xf32>
    %33 = arith.mulf %32, %4 : vector<64x32xf32>
    %cst_22 = arith.constant dense<0.000000e+00> : vector<64x16xf32>
    %34 = tpu.matmul %33, %31, %cst_22 {dimension_numbers = #tpu.dot_dimension_numbers<[1], [1], [0], [0], [0, 0, 1, 0], [], []>} : vector<64x32xf32>, vector<16x32xf32>, vector<64x16xf32> -> vector<64x16xf32>
    %c0_23 = arith.constant 0 : index
    %c0_24 = arith.constant 0 : index
    %c0_25 = arith.constant 0 : index
    %35 = vector.load %arg6[%c0_23, %c0_24, %c0_25] : memref<2x64x16xf32, #tpu.memory_space<vmem>>, vector<1x64x16xf32>
    %36 = vector.shape_cast %35 : vector<1x64x16xf32> to vector<64x16xf32>
    %37 = arith.addf %34, %36 : vector<64x16xf32>
    %cst_26 = arith.constant dense<0xFF800000> : vector<64xf32>
    %38 = vector.multi_reduction <maximumf>, %37, %cst_26 [1] : vector<64x16xf32> to vector<64xf32>
    %39 = vector.shape_cast %38 : vector<64xf32> to vector<64x1xf32>
    %40 = vector.broadcast %39 : vector<64x1xf32> to vector<64x16xf32>
    %41 = arith.subf %37, %40 : vector<64x16xf32>
    %42 = math.exp %41 : vector<64x16xf32>
    %cst_27 = arith.constant dense<0.000000e+00> : vector<64xf32>
    %43 = vector.multi_reduction <add>, %42, %cst_27 [1] : vector<64x16xf32> to vector<64xf32>
    %44 = vector.shape_cast %43 : vector<64xf32> to vector<64x1xf32>
    %45 = tpu.reciprocal %44 {approx = true} : vector<64x1xf32> -> vector<64x1xf32>
    %46 = vector.broadcast %45 : vector<64x1xf32> to vector<64x16xf32>
    %47 = arith.mulf %42, %46 : vector<64x16xf32>
    %48 = arith.mulf %47, %5 : vector<64x16xf32>
    %cst_28 = arith.constant dense<0.000000e+00> : vector<64x32xf32>
    %49 = tpu.matmul %48, %20, %cst_28 {dimension_numbers = #tpu.dot_dimension_numbers<[1], [0], [0], [1], [0, 0, 1, 1], [], []>} : vector<64x16xf32>, vector<16x32xf32>, vector<64x32xf32> -> vector<64x32xf32>
    %50 = arith.mulf %49, %4 : vector<64x32xf32>
    %cst_29 = arith.constant dense<0.000000e+00> : vector<16x32xf32>
    %51 = tpu.matmul %3, %50, %cst_29 {dimension_numbers = #tpu.dot_dimension_numbers<[1], [0], [0], [1], [0, 0, 1, 1], [], []>} : vector<16x64xf32>, vector<64x32xf32>, vector<16x32xf32> -> vector<16x32xf32>
    %c0_30 = arith.constant 0 : index
    %c0_31 = arith.constant 0 : index
    %c0_32 = arith.constant 0 : index
    %52 = vector.load %arg3[%c0_30, %c0_31, %c0_32] : memref<2x32x32xf32, #tpu.memory_space<vmem>>, vector<1x32x32xf32>
    %53 = vector.shape_cast %52 : vector<1x32x32xf32> to vector<32x32xf32>
    %cst_33 = arith.constant dense<0.000000e+00> : vector<16x32xf32>
    %54 = tpu.matmul %51, %53, %cst_33 {dimension_numbers = #tpu.dot_dimension_numbers<[1], [0], [0], [1], [0, 0, 1, 1], [], []>} : vector<16x32xf32>, vector<32x32xf32>, vector<16x32xf32> -> vector<16x32xf32>
    %55 = arith.addf %54, %0 : vector<16x32xf32>
    %56 = arith.mulf %55, %55 : vector<16x32xf32>
    %cst_34 = arith.constant dense<0.000000e+00> : vector<16xf32>
    %57 = vector.multi_reduction <add>, %56, %cst_34 [1] : vector<16x32xf32> to vector<16xf32>
    %58 = vector.shape_cast %57 : vector<16xf32> to vector<16x1xf32>
    %cst_35 = arith.constant 3.200000e+01 : f32
    %59 = vector.broadcast %cst_35 : f32 to vector<16x1xf32>
    %60 = arith.divf %58, %59 : vector<16x1xf32>
    %cst_36 = arith.constant 9.99999997E-7 : f32
    %61 = vector.broadcast %cst_36 : f32 to vector<16x1xf32>
    %62 = arith.addf %60, %61 : vector<16x1xf32>
    %63 = math.rsqrt %62 : vector<16x1xf32>
    %64 = vector.broadcast %63 : vector<16x1xf32> to vector<16x32xf32>
    %65 = arith.mulf %55, %64 : vector<16x32xf32>
    %c0_37 = arith.constant 0 : index
    %c0_38 = arith.constant 0 : index
    %c0_39 = arith.constant 0 : index
    %66 = vector.load %arg4[%c0_37, %c0_38, %c0_39] : memref<2x32x64xf32, #tpu.memory_space<vmem>>, vector<1x32x64xf32>
    %67 = vector.shape_cast %66 : vector<1x32x64xf32> to vector<32x64xf32>
    %cst_40 = arith.constant dense<0.000000e+00> : vector<16x64xf32>
    %68 = tpu.matmul %65, %67, %cst_40 {dimension_numbers = #tpu.dot_dimension_numbers<[1], [0], [0], [1], [0, 0, 1, 1], [], []>} : vector<16x32xf32>, vector<32x64xf32>, vector<16x64xf32> -> vector<16x64xf32>
    %cst_41 = arith.constant 0.000000e+00 : f32
    %69 = vector.broadcast %cst_41 : f32 to vector<16x64xf32>
    %70 = arith.maximumf %68, %69 : vector<16x64xf32>
    %c0_42 = arith.constant 0 : index
    %c0_43 = arith.constant 0 : index
    %c0_44 = arith.constant 0 : index
    %71 = vector.load %arg5[%c0_42, %c0_43, %c0_44] : memref<2x64x32xf32, #tpu.memory_space<vmem>>, vector<1x64x32xf32>
    %72 = vector.shape_cast %71 : vector<1x64x32xf32> to vector<64x32xf32>
    %cst_45 = arith.constant dense<0.000000e+00> : vector<16x32xf32>
    %73 = tpu.matmul %70, %72, %cst_45 {dimension_numbers = #tpu.dot_dimension_numbers<[1], [0], [0], [1], [0, 0, 1, 1], [], []>} : vector<16x64xf32>, vector<64x32xf32>, vector<16x32xf32> -> vector<16x32xf32>
    %74 = arith.addf %73, %55 : vector<16x32xf32>
    %75 = arith.mulf %74, %74 : vector<16x32xf32>
    %cst_46 = arith.constant dense<0.000000e+00> : vector<16xf32>
    %76 = vector.multi_reduction <add>, %75, %cst_46 [1] : vector<16x32xf32> to vector<16xf32>
    %77 = vector.shape_cast %76 : vector<16xf32> to vector<16x1xf32>
    %cst_47 = arith.constant 3.200000e+01 : f32
    %78 = vector.broadcast %cst_47 : f32 to vector<16x1xf32>
    %79 = arith.divf %77, %78 : vector<16x1xf32>
    %cst_48 = arith.constant 9.99999997E-7 : f32
    %80 = vector.broadcast %cst_48 : f32 to vector<16x1xf32>
    %81 = arith.addf %79, %80 : vector<16x1xf32>
    %82 = math.rsqrt %81 : vector<16x1xf32>
    %83 = vector.broadcast %82 : vector<16x1xf32> to vector<16x32xf32>
    %84 = arith.mulf %74, %83 : vector<16x32xf32>
    %c1 = arith.constant 1 : index
    %c0_49 = arith.constant 0 : index
    %c0_50 = arith.constant 0 : index
    %85 = vector.load %arg1[%c1, %c0_49, %c0_50] : memref<2x32x96xf32, #tpu.memory_space<vmem>>, vector<1x32x96xf32>
    %86 = vector.shape_cast %85 : vector<1x32x96xf32> to vector<32x96xf32>
    %cst_51 = arith.constant dense<0.000000e+00> : vector<16x96xf32>
    %87 = tpu.matmul %84, %86, %cst_51 {dimension_numbers = #tpu.dot_dimension_numbers<[1], [0], [0], [1], [0, 0, 1, 1], [], []>} : vector<16x32xf32>, vector<32x96xf32>, vector<16x96xf32> -> vector<16x96xf32>
    %88 = vector.extract_strided_slice %87 {offsets = [0, 0], sizes = [16, 64], strides = [1, 1]} : vector<16x96xf32> to vector<16x64xf32>
    %89 = vector.extract_strided_slice %87 {offsets = [0, 64], sizes = [16, 32], strides = [1, 1]} : vector<16x96xf32> to vector<16x32xf32>
    %90 = arith.mulf %88, %88 : vector<16x64xf32>
    %cst_52 = arith.constant dense<0.000000e+00> : vector<16x64xf32>
    %91 = tpu.matmul %90, %1, %cst_52 {dimension_numbers = #tpu.dot_dimension_numbers<[1], [0], [0], [1], [0, 0, 1, 1], [], []>} : vector<16x64xf32>, vector<64x64xf32>, vector<16x64xf32> -> vector<16x64xf32>
    %cst_53 = arith.constant 9.99999997E-7 : f32
    %92 = vector.broadcast %cst_53 : f32 to vector<16x64xf32>
    %93 = arith.addf %91, %92 : vector<16x64xf32>
    %94 = math.rsqrt %93 : vector<16x64xf32>
    %95 = arith.mulf %88, %94 : vector<16x64xf32>
    %c1_54 = arith.constant 1 : index
    %c0_55 = arith.constant 0 : index
    %96 = vector.load %arg2[%c1_54, %c0_55] : memref<2x64xf32, #tpu.memory_space<vmem>>, vector<1x64xf32>
    %97 = vector.broadcast %96 : vector<1x64xf32> to vector<16x64xf32>
    %98 = arith.mulf %95, %97 : vector<16x64xf32>
    %99 = vector.extract_strided_slice %98 {offsets = [0, 0], sizes = [16, 32], strides = [1, 1]} : vector<16x64xf32> to vector<16x32xf32>
    %100 = vector.extract_strided_slice %98 {offsets = [0, 32], sizes = [16, 32], strides = [1, 1]} : vector<16x64xf32> to vector<16x32xf32>
    %cst_56 = arith.constant dense<0.000000e+00> : vector<64x32xf32>
    %101 = tpu.matmul %2, %99, %cst_56 {dimension_numbers = #tpu.dot_dimension_numbers<[1], [0], [0], [1], [0, 0, 1, 1], [], []>} : vector<64x16xf32>, vector<16x32xf32>, vector<64x32xf32> -> vector<64x32xf32>
    %102 = arith.mulf %101, %4 : vector<64x32xf32>
    %cst_57 = arith.constant dense<0.000000e+00> : vector<64x16xf32>
    %103 = tpu.matmul %102, %100, %cst_57 {dimension_numbers = #tpu.dot_dimension_numbers<[1], [1], [0], [0], [0, 0, 1, 0], [], []>} : vector<64x32xf32>, vector<16x32xf32>, vector<64x16xf32> -> vector<64x16xf32>
    %c1_58 = arith.constant 1 : index
    %c0_59 = arith.constant 0 : index
    %c0_60 = arith.constant 0 : index
    %104 = vector.load %arg6[%c1_58, %c0_59, %c0_60] : memref<2x64x16xf32, #tpu.memory_space<vmem>>, vector<1x64x16xf32>
    %105 = vector.shape_cast %104 : vector<1x64x16xf32> to vector<64x16xf32>
    %106 = arith.addf %103, %105 : vector<64x16xf32>
    %cst_61 = arith.constant dense<0xFF800000> : vector<64xf32>
    %107 = vector.multi_reduction <maximumf>, %106, %cst_61 [1] : vector<64x16xf32> to vector<64xf32>
    %108 = vector.shape_cast %107 : vector<64xf32> to vector<64x1xf32>
    %109 = vector.broadcast %108 : vector<64x1xf32> to vector<64x16xf32>
    %110 = arith.subf %106, %109 : vector<64x16xf32>
    %111 = math.exp %110 : vector<64x16xf32>
    %cst_62 = arith.constant dense<0.000000e+00> : vector<64xf32>
    %112 = vector.multi_reduction <add>, %111, %cst_62 [1] : vector<64x16xf32> to vector<64xf32>
    %113 = vector.shape_cast %112 : vector<64xf32> to vector<64x1xf32>
    %114 = tpu.reciprocal %113 {approx = true} : vector<64x1xf32> -> vector<64x1xf32>
    %115 = vector.broadcast %114 : vector<64x1xf32> to vector<64x16xf32>
    %116 = arith.mulf %111, %115 : vector<64x16xf32>
    %117 = arith.mulf %116, %5 : vector<64x16xf32>
    %cst_63 = arith.constant dense<0.000000e+00> : vector<64x32xf32>
    %118 = tpu.matmul %117, %89, %cst_63 {dimension_numbers = #tpu.dot_dimension_numbers<[1], [0], [0], [1], [0, 0, 1, 1], [], []>} : vector<64x16xf32>, vector<16x32xf32>, vector<64x32xf32> -> vector<64x32xf32>
    %119 = arith.mulf %118, %4 : vector<64x32xf32>
    %cst_64 = arith.constant dense<0.000000e+00> : vector<16x32xf32>
    %120 = tpu.matmul %3, %119, %cst_64 {dimension_numbers = #tpu.dot_dimension_numbers<[1], [0], [0], [1], [0, 0, 1, 1], [], []>} : vector<16x64xf32>, vector<64x32xf32>, vector<16x32xf32> -> vector<16x32xf32>
    %c1_65 = arith.constant 1 : index
    %c0_66 = arith.constant 0 : index
    %c0_67 = arith.constant 0 : index
    %121 = vector.load %arg3[%c1_65, %c0_66, %c0_67] : memref<2x32x32xf32, #tpu.memory_space<vmem>>, vector<1x32x32xf32>
    %122 = vector.shape_cast %121 : vector<1x32x32xf32> to vector<32x32xf32>
    %cst_68 = arith.constant dense<0.000000e+00> : vector<16x32xf32>
    %123 = tpu.matmul %120, %122, %cst_68 {dimension_numbers = #tpu.dot_dimension_numbers<[1], [0], [0], [1], [0, 0, 1, 1], [], []>} : vector<16x32xf32>, vector<32x32xf32>, vector<16x32xf32> -> vector<16x32xf32>
    %124 = arith.addf %123, %74 : vector<16x32xf32>
    %125 = arith.mulf %124, %124 : vector<16x32xf32>
    %cst_69 = arith.constant dense<0.000000e+00> : vector<16xf32>
    %126 = vector.multi_reduction <add>, %125, %cst_69 [1] : vector<16x32xf32> to vector<16xf32>
    %127 = vector.shape_cast %126 : vector<16xf32> to vector<16x1xf32>
    %cst_70 = arith.constant 3.200000e+01 : f32
    %128 = vector.broadcast %cst_70 : f32 to vector<16x1xf32>
    %129 = arith.divf %127, %128 : vector<16x1xf32>
    %cst_71 = arith.constant 9.99999997E-7 : f32
    %130 = vector.broadcast %cst_71 : f32 to vector<16x1xf32>
    %131 = arith.addf %129, %130 : vector<16x1xf32>
    %132 = math.rsqrt %131 : vector<16x1xf32>
    %133 = vector.broadcast %132 : vector<16x1xf32> to vector<16x32xf32>
    %134 = arith.mulf %124, %133 : vector<16x32xf32>
    %c1_72 = arith.constant 1 : index
    %c0_73 = arith.constant 0 : index
    %c0_74 = arith.constant 0 : index
    %135 = vector.load %arg4[%c1_72, %c0_73, %c0_74] : memref<2x32x64xf32, #tpu.memory_space<vmem>>, vector<1x32x64xf32>
    %136 = vector.shape_cast %135 : vector<1x32x64xf32> to vector<32x64xf32>
    %cst_75 = arith.constant dense<0.000000e+00> : vector<16x64xf32>
    %137 = tpu.matmul %134, %136, %cst_75 {dimension_numbers = #tpu.dot_dimension_numbers<[1], [0], [0], [1], [0, 0, 1, 1], [], []>} : vector<16x32xf32>, vector<32x64xf32>, vector<16x64xf32> -> vector<16x64xf32>
    %cst_76 = arith.constant 0.000000e+00 : f32
    %138 = vector.broadcast %cst_76 : f32 to vector<16x64xf32>
    %139 = arith.maximumf %137, %138 : vector<16x64xf32>
    %c1_77 = arith.constant 1 : index
    %c0_78 = arith.constant 0 : index
    %c0_79 = arith.constant 0 : index
    %140 = vector.load %arg5[%c1_77, %c0_78, %c0_79] : memref<2x64x32xf32, #tpu.memory_space<vmem>>, vector<1x64x32xf32>
    %141 = vector.shape_cast %140 : vector<1x64x32xf32> to vector<64x32xf32>
    %cst_80 = arith.constant dense<0.000000e+00> : vector<16x32xf32>
    %142 = tpu.matmul %139, %141, %cst_80 {dimension_numbers = #tpu.dot_dimension_numbers<[1], [0], [0], [1], [0, 0, 1, 1], [], []>} : vector<16x64xf32>, vector<64x32xf32>, vector<16x32xf32> -> vector<16x32xf32>
    %143 = arith.addf %142, %124 : vector<16x32xf32>
    %144 = arith.mulf %143, %143 : vector<16x32xf32>
    %cst_81 = arith.constant dense<0.000000e+00> : vector<16xf32>
    %145 = vector.multi_reduction <add>, %144, %cst_81 [1] : vector<16x32xf32> to vector<16xf32>
    %146 = vector.shape_cast %145 : vector<16xf32> to vector<16x1xf32>
    %cst_82 = arith.constant 3.200000e+01 : f32
    %147 = vector.broadcast %cst_82 : f32 to vector<16x1xf32>
    %148 = arith.divf %146, %147 : vector<16x1xf32>
    %cst_83 = arith.constant 9.99999997E-7 : f32
    %149 = vector.broadcast %cst_83 : f32 to vector<16x1xf32>
    %150 = arith.addf %148, %149 : vector<16x1xf32>
    %151 = math.rsqrt %150 : vector<16x1xf32>
    %152 = vector.broadcast %151 : vector<16x1xf32> to vector<16x32xf32>
    %153 = arith.mulf %143, %152 : vector<16x32xf32>
    %c0_84 = arith.constant 0 : index
    %c0_85 = arith.constant 0 : index
    %154 = vector.load %arg12[%c0_84, %c0_85] : memref<32x128xf32, #tpu.memory_space<vmem>>, vector<32x128xf32>
    %cst_86 = arith.constant dense<0.000000e+00> : vector<16x128xf32>
    %155 = tpu.matmul %153, %154, %cst_86 {dimension_numbers = #tpu.dot_dimension_numbers<[1], [0], [0], [1], [0, 0, 1, 1], [], []>} : vector<16x32xf32>, vector<32x128xf32>, vector<16x128xf32> -> vector<16x128xf32>
    %c0_87 = arith.constant 0 : index
    %c0_88 = arith.constant 0 : index
    %156 = vector.load %arg13[%c0_87, %c0_88] : memref<16x128xf32, #tpu.memory_space<vmem>>, vector<16x128xf32>
    tpu.vector_store %arg13[%c0_87, %c0_88], %155 {strides = array<i32>} : memref<16x128xf32, #tpu.memory_space<vmem>>, vector<16x128xf32>,
    return
  }
}

</mosaic_0001>

<bundles_post_ra>
// kernel: decoder_forward.1
= control target key start
LH: loop header
LB: loop body
LE: loop exit
PB: predicated region body
PF: predicated region fallthrough
CT: control target
= control target key end

     0   :  { %vm82_vm0 = vcmask 261120   ;;  %v1619_v6 = vmov 32.0   ;;  %vm157_vm8 = vcmask 523264   ;;  %s1620_s18 = smov 96   ;;  %vm213_vm15 = vcmask 130048   ;;  %s1621_s29 = smov 64   ;;  %s2370_s0 = inlined_call_operand.vmem [shape: f32[16,32], index: 0, kind: input, shape index: {}]   ;;  %s2371_s1 = inlined_call_operand.vmem [shape: f32[2,32,96], index: 1, kind: input, shape index: {}]   ;;  %s2372_s7 = inlined_call_operand.vmem [shape: f32[64,64], index: 7, kind: input, shape index: {}]   ;;  %s2373_s2 = inlined_call_operand.vmem [shape: f32[2,64], index: 2, kind: input, shape index: {}]   ;;  %s2374_s8 = inlined_call_operand.vmem [shape: f32[64,16], index: 8, kind: input, shape index: {}]   ;;  %s2375_s10 = inlined_call_operand.vmem [shape: f32[64,32], index: 10, kind: input, shape index: {}]   ;;  %s2376_s6 = inlined_call_operand.vmem [shape: f32[2,64,16], index: 6, kind: input, shape index: {}]   ;;  %s2377_s11 = inlined_call_operand.vmem [shape: f32[64,16], index: 11, kind: input, shape index: {}]   ;;  %s2378_s9 = inlined_call_operand.vmem [shape: f32[16,64], index: 9, kind: input, shape index: {}]   ;;  %s2379_s3 = inlined_call_operand.vmem [shape: f32[2,32,32], index: 3, kind: input, shape index: {}]   ;;  %s2380_s4 = inlined_call_operand.vmem [shape: f32[2,32,64], index: 4, kind: input, shape index: {}]   ;;  %s2381_s5 = inlined_call_operand.vmem [shape: f32[2,64,32], index: 5, kind: input, shape index: {}]   ;;  %s2382_s12 = inlined_call_operand.vmem [shape: f32[32,128], index: 12, kind: input, shape index: {}]   ;;  %s2383_s13 = inlined_call_operand.vmem [shape: f32[16,128], index: 13, kind: output, shape index: {}]  }
   0x1   :  { %v1695_v0 = vld [vmem:[%s2370_s0] sm:$0xff]  ;;  %v1702_v2 = vld [vmem:[%s2370_s0 + $0x8] sm:$0xff]  ;;  %1517 = vrcp.f32 %v1619_v6  ;;  %v125_v9 = vld [vmem:[%s2371_s1 + $0x18] sm:$0xff] }
   0x2   :  { %v80_v1 = vmul.f32 %v1695_v0, %v1695_v0  ;;  %v81_v4 = vmul.f32 %v1702_v2, %v1702_v2  ;;  %144 = vmatpush.msra.mxu0 %v125_v9  ;;  %v124_v11 = vld [vmem:[%s2371_s1 + $0x10] sm:$0xff]  ;;  %v123_v12 = vld [vmem:[%s2371_s1 + $0x8] sm:$0xff]  ;;  %v122_v14 = vld [vmem:[%s2371_s1] sm:$0xff] }
   0x3   :  { %v1726_v19 = vld [vmem:[%s2372_s7 + $0x38] sm:$0xff]  ;;  %v1731_v20 = vld [vmem:[%s2372_s7 + $0x30] sm:$0xff]  ;;  %v1737_v22 = vld [vmem:[%s2372_s7 + $0x28] sm:$0xff] }
   0x4   :  { %v83_v3 = vsel %vm82_vm0, %v80_v1, 0.0  ;;  %v86_v5 = vsel %vm82_vm0, %v81_v4, 0.0  ;;  %145 = vmatpush.msra.mxu0 %v124_v11  ;;  %172 = vmatpush.msra.mxu1 %v1726_v19  ;;  %v1743_v23 = vld [vmem:[%s2372_s7 + $0x20] sm:$0xff]  ;;  %v1749_v24 = vld [vmem:[%s2372_s7 + $0x18] sm:$0xff]  ;;  %v1756_v27 = vld [vmem:[%s2372_s7 + $0x10] sm:$0xff] }
   0x5   :  { %84 = vadd.xlane.f32.xlu0 %v83_v3  ;;  %v1767_v45 = vld [vmem:[%s2372_s7 + $0x8] sm:$0xff]  ;;  %v1773_v46 = vld [vmem:[%s2372_s7] sm:$0xff] }
   0x6   :  { %146 = vmatpush.msra.mxu0 %v123_v12  ;;  %173 = vmatpush.msra.mxu1 %v1731_v20  ;;  %v1795_v12 = vld [vmem:[%s2374_s8] sm:$0xff] }
   0x7   :  { %v1518_v7 = vpop.eup %1517 }
   0x8   :  { %v90_v8 = vmul.f32 32.0, %v1518_v7  ;;  %147 = vmatpush.msra.mxu0 %v122_v14  ;;  %vm94_vm1 = vweird.f32 %v1518_v7  ;;  %174 = vmatpush.msra.mxu1 %v1737_v22  ;;  %v1810_v14 = vld [vmem:[%s2374_s8 + $0x10] sm:$0xff] }
   0xa   :  { %v91_v10 = vsub.f32 1.0, %v90_v8  ;;  %175 = vmatpush.msra.mxu1 %v1743_v23  ;;  %v1515_v8 = vld [vmem:[%s2373_s2] ss:$0 sm:$0xff] }
   0xc   :  { %v92_v13 = vmul.f32 %v1518_v7, %v91_v10  ;;  %176 = vmatpush.msra.mxu1 %v1749_v24 }
   0xd   :  { %87 = vadd.xlane.f32.xlu0 %v86_v5 }
   0xe   :  { %v93_v15 = vadd.f32 %v1518_v7, %v92_v13  ;;  %177 = vmatpush.msra.mxu1 %v1756_v27  ;;  %v1803_v13 = vld [vmem:[%s2374_s8 + $0x8] sm:$0xff] }
  0x10   :  { %v1720_v16 = vsel %vm94_vm1, %v1518_v7, %v93_v15  ;;  %178 = vmatpush.msra.mxu1 %v1767_v45  ;;  %v1817_v15 = vld [vmem:[%s2374_s8 + $0x18] sm:$0xff] }
  0x12   :  { %179 = vmatpush.msra.mxu1 %v1773_v46 }
  0x78   :  { %v85_v17 = vpop.xlane.xlu0 %84 }
  0x79   :  { %v96_v18 = vmul.f32 %v1720_v16, %v85_v17  ;;  %v1824_v17 = vld [vmem:[%s2374_s8 + $0x20] sm:$0xff] }
  0x7b   :  { %v98_v21 = vadd.f32 1e-06, %v96_v18  ;;  %v1831_v18 = vld [vmem:[%s2374_s8 + $0x28] sm:$0xff] }
  0x7d   :  { %1519 = vrsqrt.f32 %v98_v21  ;;  %vm106_vm3 = vweird.f32 %v98_v21 }
  0x80   :  { %v88_v25 = vpop.xlane.xlu0 %87 }
  0x81   :  { %v97_v26 = vmul.f32 %v1720_v16, %v88_v25  ;;  %v1845_v25 = vld [vmem:[%s2374_s8 + $0x38] sm:$0xff] }
  0x83   :  { %v1520_v28 = vpop.eup %1519  ;;  %v99_v29 = vadd.f32 1e-06, %v97_v26 }
  0x84   :  { %v101_v30 = vmul.f32 %v1520_v28, %v98_v21  ;;  %vm107_vm2 = vweird.f32 %v1520_v28  ;;  %v1838_v21 = vld [vmem:[%s2374_s8 + $0x30] sm:$0xff] }
  0x85   :  { %1521 = vrsqrt.f32 %v99_v29  ;;  %vm108_vm4 = vmor %vm106_vm3, %vm107_vm2  ;;  %vm116_vm6 = vweird.f32 %v99_v29 }
  0x86   :  { %v102_v31 = vmul.f32 %v1520_v28, %v101_v30 }
  0x88   :  { %v103_v32 = vmul.f32 0.5, %v102_v31 }
  0x8a   :  { %v104_v33 = vsub.f32 1.5, %v103_v32  ;;  %v1861_v32 = vld [vmem:[%s2375_s10 + $0x8] sm:$0xff] }
  0x8b   :  { %v1522_v34 = vpop.eup %1521 }
  0x8c   :  { %v111_v35 = vmul.f32 %v1522_v34, %v99_v29  ;;  %v105_v36 = vmul.f32 %v1520_v28, %v104_v33  ;;  %vm117_vm5 = vweird.f32 %v1522_v34  ;;  %v1854_v29 = vld [vmem:[%s2375_s10] sm:$0xff] }
  0x8d   :  { %vm118_vm7 = vmor %vm116_vm6, %vm117_vm5 }
  0x8e   :  { %v112_v37 = vmul.f32 %v1522_v34, %v111_v35  ;;  %v109_v38 = vsel %vm108_vm4, %v1520_v28, %v105_v36  ;;  %v1868_v35 = vld [vmem:[%s2375_s10 + $0x10] sm:$0xff] }
  0x8f   :  { %v120_v39 = vmul.f32 %v109_v38, %v1695_v0  ;;  %v1875_v38 = vld [vmem:[%s2375_s10 + $0x18] sm:$0xff] }
  0x90   :  { %v113_v40 = vmul.f32 0.5, %v112_v37 }
  0x91   :  { %1388 = vmatmul.msk.f32.vlgmr.msra.gmra.mxu0 %vm82_vm0, %v120_v39 }
  0x92   :  { %v114_v41 = vsub.f32 1.5, %v113_v40 }
  0x94   :  { %v115_v42 = vmul.f32 %v1522_v34, %v114_v41  ;;  %v1882_v41 = vld [vmem:[%s2375_s10 + $0x20] sm:$0xff] }
  0x96   :  { %v119_v43 = vsel %vm118_vm7, %v1522_v34, %v115_v42 }
  0x97   :  { %v121_v44 = vmul.f32 %v119_v43, %v1702_v2 }
  0x99   :  { %1389 = vmatmul.msk.f32.gmra.mxu0 %vm82_vm0, %v121_v44  ;;  %v1889_v44 = vld [vmem:[%s2375_s10 + $0x28] sm:$0xff] }
 0x10e   :  { %v1776_v47 = vpop.f32.mrf.mxu0 }
 0x10f   :  { %v155_v48 = vmul.f32 %v1776_v47, %v1776_v47 }
 0x111   :  { %1390 = vmatmul.msk.f32.vlgmr.msra.gmra.mxu1 %vm157_vm8, %v155_v48 }
 0x116   :  { %v1781_v49 = vpop.f32.mrf.mxu0 }
 0x117   :  { %v156_v50 = vmul.f32 %v1781_v49, %v1781_v49 }
 0x119   :  { %1391 = vmatmul.msk.f32.gmra.mxu1 %vm157_vm8, %v156_v50 }
 0x18e   :  { %v181_v51 = vpop.f32.mrf.mxu1 }
 0x18f   :  { %v182_v52 = vadd.f32 1e-06, %v181_v51  ;;  %v1896_v51 = vld [vmem:[%s2375_s10 + $0x30] sm:$0xff] }
 0x191   :  { %1523 = vrsqrt.f32 %v182_v52  ;;  %vm193_vm10 = vweird.f32 %v182_v52 }
 0x196   :  { %v184_v53 = vpop.f32.mrf.mxu1 }
 0x197   :  { %v1524_v54 = vpop.eup %1523  ;;  %v185_v55 = vadd.f32 1e-06, %v184_v53 }
 0x198   :  { %v188_v56 = vmul.f32 %v1524_v54, %v182_v52  ;;  %vm194_vm9 = vweird.f32 %v1524_v54 }
 0x199   :  { %1525 = vrsqrt.f32 %v185_v55  ;;  %vm195_vm12 = vmor %vm193_vm10, %vm194_vm9  ;;  %vm203_vm13 = vweird.f32 %v185_v55 }
 0x19a   :  { %v189_v57 = vmul.f32 %v1524_v54, %v188_v56 }
 0x19c   :  { %v190_v58 = vmul.f32 0.5, %v189_v57  ;;  %v287_v57 = vld [vmem:[%s2376_s6] sm:$0xff] }
 0x19e   :  { %v191_v60 = vsub.f32 1.5, %v190_v58 }
 0x19f   :  { %v1526_v59 = vpop.eup %1525 }
 0x1a0   :  { %v198_v61 = vmul.f32 %v1526_v59, %v185_v55  ;;  %v192_v1 = vmul.f32 %v1524_v54, %v191_v60  ;;  %vm204_vm11 = vweird.f32 %v1526_v59 }
 0x1a1   :  { %vm205_vm14 = vmor %vm203_vm13, %vm204_vm11 }
 0x1a2   :  { %v199_v62 = vmul.f32 %v1526_v59, %v198_v61  ;;  %v196_v5 = vsel %vm195_vm12, %v1524_v54, %v192_v1  ;;  %v1903_v54 = vld [vmem:[%s2375_s10 + $0x38] sm:$0xff]  ;;  %v288_v61 = vld [vmem:[%s2376_s6 + $0x8] sm:$0xff] }
 0x1a3   :  { %v207_v9 = vmul.f32 %v196_v5, %v1776_v47 }
 0x1a4   :  { %v200_v63 = vmul.f32 0.5, %v199_v62 }
 0x1a5   :  { %v211_v11 = vmul.f32 %v1515_v8, %v207_v9 }
 0x1a6   :  { %v201_v3 = vsub.f32 1.5, %v200_v63 }
 0x1a8   :  { %v202_v4 = vmul.f32 %v1526_v59, %v201_v3  ;;  %v289_v3 = vld [vmem:[%s2376_s6 + $0x10] sm:$0xff] }
 0x1aa   :  { %v206_v6 = vsel %vm205_vm14, %v1526_v59, %v202_v4 }
 0x1ab   :  { %v208_v7 = vmul.f32 %v206_v6, %v1781_v49 }
 0x1ad   :  { %v212_v10 = vmul.f32 %v1515_v8, %v208_v7  ;;  %v290_v7 = vld [vmem:[%s2376_s6 + $0x18] sm:$0xff] }
 0x1af   :  { %299 = vrot.lane.b32.xlu1 %v212_v10, %s1620_s18  ;;  %252 = vmatpush.msra.mxu2 %v212_v10 }
 0x1b1   :  { %253 = vmatpush.msra.mxu2 %v211_v11 }
 0x1b2   :  { %1392 = vmatmul.msk.f32.vlgmr.msra.gmra.mxu2 %vm213_vm15, %v1795_v12 }
 0x1b7   :  { %297 = vrot.lane.b32.xlu1 %v211_v11, %s1620_s18  ;;  %v291_v11 = vld [vmem:[%s2376_s6 + $0x20] sm:$0xff] }
 0x1ba   :  { %1393 = vmatmul.msk.f32.gmra.mxu2 %vm213_vm15, %v1803_v13 }
 0x1c2   :  { %1394 = vmatmul.msk.f32.gmra.mxu2 %vm213_vm15, %v1810_v14 }
 0x1ca   :  { %1395 = vmatmul.msk.f32.gmra.mxu2 %vm213_vm15, %v1817_v15 }
 0x1d2   :  { %1396 = vmatmul.msk.f32.gmra.mxu2 %vm213_vm15, %v1824_v17 }
 0x1da   :  { %1397 = vmatmul.msk.f32.gmra.mxu2 %vm213_vm15, %v1831_v18 }
 0x1e2   :  { %1398 = vmatmul.msk.f32.gmra.mxu2 %vm213_vm15, %v1838_v21 }
 0x1ea   :  { %1399 = vmatmul.msk.f32.gmra.mxu2 %vm213_vm15, %v1845_v25 }
 0x221   :  { %v300_v26 = vpop.permute.xlu1 %299 }
 0x222   :  { %1400 = vmatpush.xpose.msk.msra.mxu3 %vm82_vm0, %v300_v26 }
 0x229   :  { %v298_v28 = vpop.permute.xlu1 %297 }
 0x22a   :  { %1401 = vmatpush.xpose.msk.msra.mxu3 %vm82_vm0, %v298_v28 }
 0x235   :  { %v255_v30 = vpop.f32.mrf.mxu2 }
 0x236   :  { %v279_v31 = vmul.f32 %v255_v30, %v1854_v29 }
 0x238   :  { %1402 = vmatmul.msk.f32.vlgmr.msra.gmra.mxu3 %vm82_vm0, %v279_v31  ;;  %v292_v31 = vld [vmem:[%s2376_s6 + $0x28] sm:$0xff] }
 0x23d   :  { %v258_v33 = vpop.f32.mrf.mxu2 }
 0x23e   :  { %v280_v34 = vmul.f32 %v258_v33, %v1861_v32 }
 0x240   :  { %1403 = vmatmul.msk.f32.gmra.mxu3 %vm82_vm0, %v280_v34 }
 0x245   :  { %v261_v36 = vpop.f32.mrf.mxu2 }
 0x246   :  { %v281_v37 = vmul.f32 %v261_v36, %v1868_v35 }
 0x248   :  { %1404 = vmatmul.msk.f32.gmra.mxu3 %vm82_vm0, %v281_v37  ;;  %v293_v37 = vld [vmem:[%s2376_s6 + $0x30] sm:$0xff] }
 0x24d   :  { %v264_v39 = vpop.f32.mrf.mxu2 }
 0x24e   :  { %v282_v40 = vmul.f32 %v264_v39, %v1875_v38 }
 0x250   :  { %1405 = vmatmul.msk.f32.gmra.mxu3 %vm82_vm0, %v282_v40 }
 0x255   :  { %v267_v42 = vpop.f32.mrf.mxu2 }
 0x256   :  { %v283_v43 = vmul.f32 %v267_v42, %v1882_v41 }
 0x258   :  { %1406 = vmatmul.msk.f32.gmra.mxu3 %vm82_vm0, %v283_v43  ;;  %v294_v43 = vld [vmem:[%s2376_s6 + $0x38] sm:$0xff] }
 0x25d   :  { %v270_v48 = vpop.f32.mrf.mxu2 }
 0x25e   :  { %v284_v50 = vmul.f32 %v270_v48, %v1889_v44 }
 0x260   :  { %1407 = vmatmul.msk.f32.gmra.mxu3 %vm82_vm0, %v284_v50 }
 0x265   :  { %v273_v52 = vpop.f32.mrf.mxu2 }
 0x266   :  { %v285_v53 = vmul.f32 %v273_v52, %v1896_v51 }
 0x268   :  { %1408 = vmatmul.msk.f32.gmra.mxu3 %vm82_vm0, %v285_v53  ;;  %v1505_v53 = vpack.i.bf16 %v1776_v47, %v1781_v49 }
 0x26d   :  { %v276_v55 = vpop.f32.mrf.mxu2 }
 0x26e   :  { %v286_v56 = vmul.f32 %v276_v55, %v1903_v54 }
 0x270   :  { %1409 = vmatmul.msk.f32.gmra.mxu3 %vm82_vm0, %v286_v56 }
 0x2bb   :  { %v346_v58 = vpop.f32.mrf.mxu3 }
 0x2bc   :  { %v347_v59 = vadd.f32 %v346_v58, %v287_v57 }
 0x2be   :  { %v370_v60 = vsel %vm213_vm15, %v347_v59, -inf }
 0x2bf   :  { %371 = vmax.xlane.f32.xlu2 %v370_v60 }
 0x2c3   :  { %v349_v62 = vpop.f32.mrf.mxu3 }
 0x2c4   :  { %v350_v63 = vadd.f32 %v349_v62, %v288_v61 }
 0x2c6   :  { %v373_v1 = vsel %vm213_vm15, %v350_v63, -inf }
 0x2c7   :  { %374 = vmax.xlane.f32.xlu2 %v373_v1 }
 0x2cb   :  { %v352_v4 = vpop.f32.mrf.mxu3 }
 0x2cc   :  { %v353_v5 = vadd.f32 %v352_v4, %v289_v3 }
 0x2ce   :  { %v376_v6 = vsel %vm213_vm15, %v353_v5, -inf }
 0x2cf   :  { %377 = vmax.xlane.f32.xlu0 %v376_v6 }
 0x2d3   :  { %v355_v8 = vpop.f32.mrf.mxu3 }
 0x2d4   :  { %v356_v9 = vadd.f32 %v355_v8, %v290_v7 }
 0x2d6   :  { %v379_v10 = vsel %vm213_vm15, %v356_v9, -inf }
 0x2d7   :  { %380 = vmax.xlane.f32.xlu1 %v379_v10 }
 0x2db   :  { %v358_v26 = vpop.f32.mrf.mxu3 }
 0x2dc   :  { %v359_v28 = vadd.f32 %v358_v26, %v291_v11 }
 0x2de   :  { %v382_v30 = vsel %vm213_vm15, %v359_v28, -inf }
 0x2df   :  { %383 = vmax.xlane.f32.xlu2 %v382_v30 }
 0x2e3   :  { %v361_v33 = vpop.f32.mrf.mxu3 }
 0x2e4   :  { %v362_v34 = vadd.f32 %v361_v33, %v292_v31 }
 0x2e6   :  { %v385_v36 = vsel %vm213_vm15, %v362_v34, -inf }
 0x2e7   :  { %386 = vmax.xlane.f32.xlu0 %v385_v36 }
 0x2eb   :  { %v364_v39 = vpop.f32.mrf.mxu3 }
 0x2ec   :  { %v365_v40 = vadd.f32 %v364_v39, %v293_v37 }
 0x2ee   :  { %v388_v42 = vsel %vm213_vm15, %v365_v40, -inf }
 0x2ef   :  { %389 = vmax.xlane.f32.xlu2 %v388_v42 }
 0x2f3   :  { %v367_v48 = vpop.f32.mrf.mxu3 }
 0x2f4   :  { %v368_v50 = vadd.f32 %v367_v48, %v294_v43 }
 0x2f6   :  { %v391_v52 = vsel %vm213_vm15, %v368_v50, -inf }
 0x2f7   :  { %392 = vmax.xlane.f32.xlu2 %v391_v52 }
 0x30f   :  { %1506 = vrot.lane.b32.xlu2 %v1505_v53, %s1621_s29 }
 0x332   :  { %v372_v55 = vpop.xlane.xlu2 %371 }
 0x333   :  { %v394_v56 = vsub.f32 %v347_v59, %v372_v55 }
 0x335   :  { %v402_v57 = vmul.f32 1.442695, %v394_v56 }
 0x337   :  { %1527 = vpow2.f32 %v402_v57 }
 0x33a   :  { %v375_v58 = vpop.xlane.xlu2 %374 }
 0x33b   :  { %v395_v60 = vsub.f32 %v350_v63, %v375_v58 }
 0x33d   :  { %v1528_v61 = vpop.eup %1527  ;;  %v404_v62 = vmul.f32 1.442695, %v395_v60 }
 0x33e   :  { %v418_v1 = vsel %vm213_vm15, %v1528_v61, 0.0 }
 0x33f   :  { %1529 = vpow2.f32 %v404_v62  ;;  %419 = vadd.xlane.f32.xlu0 %v418_v1 }
 0x342   :  { %v378_v3 = vpop.xlane.xlu0 %377 }
 0x343   :  { %v396_v4 = vsub.f32 %v353_v5, %v378_v3 }
 0x345   :  { %v1530_v6 = vpop.eup %1529  ;;  %v406_v7 = vmul.f32 1.442695, %v396_v4 }
 0x346   :  { %v421_v47 = vsel %vm213_vm15, %v1530_v6, 0.0 }
 0x347   :  { %1531 = vpow2.f32 %v406_v7  ;;  %422 = vadd.xlane.f32.xlu0 %v421_v47 }
 0x34a   :  { %v381_v49 = vpop.xlane.xlu1 %380 }
 0x34b   :  { %v397_v59 = vsub.f32 %v356_v9, %v381_v49 }
 0x34d   :  { %v1532_v8 = vpop.eup %1531  ;;  %v408_v10 = vmul.f32 1.442695, %v397_v59 }
 0x34e   :  { %v424_v63 = vsel %vm213_vm15, %v1532_v8, 0.0 }
 0x34f   :  { %1533 = vpow2.f32 %v408_v10  ;;  %425 = vadd.xlane.f32.xlu0 %v424_v63  ;;  %v1960_v10 = vld [vmem:[%s2377_s11 + $0x8] sm:$0xff] }
 0x352   :  { %v384_v11 = vpop.xlane.xlu2 %383 }
 0x353   :  { %v398_v26 = vsub.f32 %v359_v28, %v384_v11 }
 0x355   :  { %v1534_v30 = vpop.eup %1533  ;;  %v410_v31 = vmul.f32 1.442695, %v398_v26 }
 0x356   :  { %v427_v5 = vsel %vm213_vm15, %v1534_v30, 0.0 }
 0x357   :  { %1535 = vpow2.f32 %v410_v31  ;;  %428 = vadd.xlane.f32.xlu0 %v427_v5  ;;  %v1967_v31 = vld [vmem:[%s2377_s11 + $0x10] sm:$0xff] }
 0x35a   :  { %v387_v33 = vpop.xlane.xlu0 %386 }
 0x35b   :  { %v399_v36 = vsub.f32 %v362_v34, %v387_v33 }
 0x35d   :  { %v1536_v37 = vpop.eup %1535  ;;  %v412_v39 = vmul.f32 1.442695, %v399_v36 }
 0x35e   :  { %v430_v9 = vsel %vm213_vm15, %v1536_v37, 0.0 }
 0x35f   :  { %1537 = vpow2.f32 %v412_v39  ;;  %431 = vadd.xlane.f32.xlu1 %v430_v9 }
 0x362   :  { %v390_v42 = vpop.xlane.xlu2 %389 }
 0x363   :  { %v400_v43 = vsub.f32 %v365_v40, %v390_v42 }
 0x365   :  { %v1538_v48 = vpop.eup %1537  ;;  %v414_v52 = vmul.f32 1.442695, %v400_v43 }
 0x366   :  { %v433_v28 = vsel %vm213_vm15, %v1538_v48, 0.0 }
 0x367   :  { %1539 = vpow2.f32 %v414_v52  ;;  %434 = vadd.xlane.f32.xlu0 %v433_v28 }
 0x36a   :  { %v393_v53 = vpop.xlane.xlu2 %392 }
 0x36b   :  { %v401_v55 = vsub.f32 %v368_v50, %v393_v53  ;;  %v1953_v50 = vld [vmem:[%s2377_s11] sm:$0xff] }
 0x36d   :  { %v1540_v56 = vpop.eup %1539  ;;  %v416_v57 = vmul.f32 1.442695, %v401_v55 }
 0x36e   :  { %v436_v34 = vsel %vm213_vm15, %v1540_v56, 0.0 }
 0x36f   :  { %1541 = vpow2.f32 %v416_v57  ;;  %437 = vadd.xlane.f32.xlu2 %v436_v34 }
 0x372   :  { %v1507_v58 = vpop.permute.xlu2 %1506 }
 0x373   :  { %v1508_v60 = vunpack.i.l.bf16 %v1507_v58  ;;  %v1509_v1 = vunpack.i.h.bf16 %v1507_v58 }
 0x375   :  { %v1542_v62 = vpop.eup %1541  ;;  %512 = vmatpush.msrb.mxu0 %v1508_v60 }
 0x376   :  { %v439_v40 = vsel %vm213_vm15, %v1542_v62, 0.0 }
 0x377   :  { %440 = vadd.xlane.f32.xlu1 %v439_v40  ;;  %513 = vmatpush.msrb.mxu0 %v1509_v1 }
 0x3b2   :  { %v420_v3 = vpop.xlane.xlu0 %419 }
 0x3b3   :  { %1543 = vrcp.f32 %v420_v3 }
 0x3b9   :  { %v1544_v4 = vpop.eup %1543 }
 0x3ba   :  { %v450_v7 = vmul.f32 %v1544_v4, %v1528_v61  ;;  %v423_v47 = vpop.xlane.xlu0 %422 }
 0x3bb   :  { %1545 = vrcp.f32 %v423_v47 }
 0x3bc   :  { %v458_v49 = vmul.f32 %v450_v7, %v1953_v50 }
 0x3be   :  { %1410 = vmatmul.msk.f32.vlgmr.msrb.gmra.mxu0 %vm213_vm15, %v458_v49 }
 0x3c1   :  { %v1546_v59 = vpop.eup %1545 }
 0x3c2   :  { %v426_v63 = vpop.xlane.xlu0 %425  ;;  %v451_v11 = vmul.f32 %v1546_v59, %v1530_v6  ;;  %v1974_v6 = vld [vmem:[%s2377_s11 + $0x18] sm:$0xff] }
 0x3c3   :  { %1547 = vrcp.f32 %v426_v63 }
 0x3c4   :  { %v459_v26 = vmul.f32 %v451_v11, %v1960_v10 }
 0x3c6   :  { %1411 = vmatmul.msk.f32.gmra.mxu0 %vm213_vm15, %v459_v26 }
 0x3c9   :  { %v1548_v61 = vpop.eup %1547 }
 0x3ca   :  { %v429_v5 = vpop.xlane.xlu0 %428  ;;  %v452_v33 = vmul.f32 %v1548_v61, %v1532_v8  ;;  %v1981_v8 = vld [vmem:[%s2377_s11 + $0x20] sm:$0xff] }
 0x3cb   :  { %1549 = vrcp.f32 %v429_v5 }
 0x3cc   :  { %v460_v36 = vmul.f32 %v452_v33, %v1967_v31 }
 0x3ce   :  { %1412 = vmatmul.msk.f32.gmra.mxu0 %vm213_vm15, %v460_v36 }
 0x3d1   :  { %v1550_v39 = vpop.eup %1549 }
 0x3d2   :  { %v432_v9 = vpop.xlane.xlu1 %431  ;;  %v453_v42 = vmul.f32 %v1550_v39, %v1534_v30  ;;  %v1988_v30 = vld [vmem:[%s2377_s11 + $0x28] sm:$0xff] }
 0x3d3   :  { %1551 = vrcp.f32 %v432_v9 }
 0x3d4   :  { %v461_v43 = vmul.f32 %v453_v42, %v1974_v6 }
 0x3d6   :  { %1413 = vmatmul.msk.f32.gmra.mxu0 %vm213_vm15, %v461_v43 }
 0x3d9   :  { %v1552_v52 = vpop.eup %1551 }
 0x3da   :  { %v435_v28 = vpop.xlane.xlu0 %434  ;;  %v454_v53 = vmul.f32 %v1552_v52, %v1536_v37  ;;  %v1995_v37 = vld [vmem:[%s2377_s11 + $0x30] sm:$0xff] }
 0x3db   :  { %1553 = vrcp.f32 %v435_v28 }
 0x3dc   :  { %v462_v55 = vmul.f32 %v454_v53, %v1981_v8  ;;  %v2017_v53 = vld [vmem:[%s2378_s9] sm:$0xff] }
 0x3de   :  { %1414 = vmatmul.msk.f32.gmra.mxu0 %vm213_vm15, %v462_v55  ;;  %v579_v55 = vld [vmem:[%s2379_s3 + $0x18] sm:$0xff] }
 0x3e1   :  { %v1554_v57 = vpop.eup %1553 }
 0x3e2   :  { %v438_v34 = vpop.xlane.xlu2 %437  ;;  %v455_v58 = vmul.f32 %v1554_v57, %v1538_v48  ;;  %v2002_v48 = vld [vmem:[%s2377_s11 + $0x38] sm:$0xff]  ;;  %v578_v57 = vld [vmem:[%s2379_s3 + $0x10] sm:$0xff] }
 0x3e3   :  { %1555 = vrcp.f32 %v438_v34  ;;  %v577_v34 = vld [vmem:[%s2379_s3 + $0x8] sm:$0xff] }
 0x3e4   :  { %v463_v60 = vmul.f32 %v455_v58, %v1988_v30  ;;  %v2033_v58 = vld [vmem:[%s2378_s9 + $0x8] sm:$0xff] }
 0x3e6   :  { %1415 = vmatmul.msk.f32.gmra.mxu0 %vm213_vm15, %v463_v60  ;;  %v576_v60 = vld [vmem:[%s2379_s3] sm:$0xff] }
 0x3e9   :  { %v1556_v1 = vpop.eup %1555 }
 0x3ea   :  { %v441_v40 = vpop.xlane.xlu1 %440  ;;  %v456_v3 = vmul.f32 %v1556_v1, %v1540_v56 }
 0x3eb   :  { %1557 = vrcp.f32 %v441_v40 }
 0x3ec   :  { %v464_v4 = vmul.f32 %v456_v3, %v1995_v37 }
 0x3ee   :  { %1416 = vmatmul.msk.f32.gmra.mxu0 %vm213_vm15, %v464_v4 }
 0x3f1   :  { %v1558_v7 = vpop.eup %1557 }
 0x3f2   :  { %v457_v47 = vmul.f32 %v1558_v7, %v1542_v62 }
 0x3f4   :  { %v465_v49 = vmul.f32 %v457_v47, %v2002_v48 }
 0x3f6   :  { %1417 = vmatmul.msk.f32.gmra.mxu0 %vm213_vm15, %v465_v49 }
 0x43b   :  { %v515_v59 = vpop.f32.mrf.mxu0 }
 0x43c   :  { %v539_v28 = vmul.f32 %v515_v59, %v1854_v29 }
 0x443   :  { %v518_v63 = vpop.f32.mrf.mxu0 }
 0x444   :  { %v540_v52 = vmul.f32 %v518_v63, %v1861_v32 }
 0x44b   :  { %v521_v11 = vpop.f32.mrf.mxu0 }
 0x44c   :  { %v541_v43 = vmul.f32 %v521_v11, %v1868_v35 }
 0x453   :  { %v524_v56 = vpop.f32.mrf.mxu0 }
 0x454   :  { %v542_v42 = vmul.f32 %v524_v56, %v1875_v38  ;;  %v645_v56 = vld [vmem:[%s2380_s4 + $0x10] sm:$0xff] }
 0x45b   :  { %v527_v26 = vpop.f32.mrf.mxu0 }
 0x45c   :  { %v543_v62 = vmul.f32 %v527_v26, %v1882_v41  ;;  %v643_v26 = vld [vmem:[%s2380_s4] sm:$0xff] }
 0x463   :  { %v530_v61 = vpop.f32.mrf.mxu0 }
 0x464   :  { %v544_v9 = vmul.f32 %v530_v61, %v1889_v44 }
 0x46b   :  { %v533_v5 = vpop.f32.mrf.mxu0 }
 0x46c   :  { %v545_v39 = vmul.f32 %v533_v5, %v1896_v51 }
 0x473   :  { %v536_v33 = vpop.f32.mrf.mxu0 }
 0x474   :  { %v546_v36 = vmul.f32 %v536_v33, %v1903_v54  ;;  %v685_v33 = vld [vmem:[%s2381_s5 + $0x38] sm:$0xff] }
 0x475   :  { %700 = vmatpush.msra.mxu0 %v685_v33  ;;  %1494 = vmatpush.msrb.mxu2 %v685_v33 }
 0x476   :  { %561 = vmatpush.msrb.mxu1 %v546_v36  ;;  %v684_v36 = vld [vmem:[%s2381_s5 + $0x30] sm:$0xff] }
 0x477   :  { %701 = vmatpush.msra.mxu0 %v684_v36  ;;  %1495 = vmatpush.msrb.mxu2 %v684_v36 }
 0x478   :  { %562 = vmatpush.msrb.mxu1 %v545_v39  ;;  %v680_v39 = vld [vmem:[%s2381_s5 + $0x10] sm:$0xff] }
 0x47a   :  { %563 = vmatpush.msrb.mxu1 %v544_v9 }
 0x47c   :  { %564 = vmatpush.msrb.mxu1 %v543_v62  ;;  %v679_v62 = vld [vmem:[%s2381_s5 + $0x8] sm:$0xff] }
 0x47e   :  { %565 = vmatpush.msrb.mxu1 %v542_v42 }
 0x480   :  { %566 = vmatpush.msrb.mxu1 %v541_v43 }
 0x482   :  { %567 = vmatpush.msrb.mxu1 %v540_v52 }
 0x484   :  { %568 = vmatpush.msrb.mxu1 %v539_v28 }
 0x485   :  { %1418 = vmatmul.msk.f32.vlgmr.msrb.gmra.mxu1 %vm157_vm8, %v2017_v53 }
 0x486   :  { %598 = vmatpush.msra.mxu1 %v579_v55 }
 0x488   :  { %599 = vmatpush.msra.mxu1 %v578_v57 }
 0x48a   :  { %600 = vmatpush.msra.mxu1 %v577_v34 }
 0x48c   :  { %601 = vmatpush.msra.mxu1 %v576_v60 }
 0x48d   :  { %1419 = vmatmul.msk.f32.gmra.mxu1 %vm157_vm8, %v2033_v58 }
 0x502   :  { %v570_v1 = vpop.f32.mrf.mxu1 }
 0x503   :  { %1420 = vmatmul.msk.f32.vlgmr.msra.gmra.mxu1 %vm82_vm0, %v570_v1 }
 0x50a   :  { %v573_v40 = vpop.f32.mrf.mxu1 }
 0x50b   :  { %1421 = vmatmul.msk.f32.gmra.mxu1 %vm82_vm0, %v573_v40 }
 0x580   :  { %v603_v3 = vpop.f32.mrf.mxu1 }
 0x581   :  { %v2043_v4 = vadd.f32 %v603_v3, %v1695_v0  ;;  %v646_v0 = vld [vmem:[%s2380_s4 + $0x18] sm:$0xff] }
 0x582   :  { %665 = vmatpush.msrb.mxu1 %v646_v0 }
 0x583   :  { %v609_v7 = vmul.f32 %v2043_v4, %v2043_v4 }
 0x584   :  { %666 = vmatpush.msrb.mxu1 %v645_v56 }
 0x585   :  { %v611_v47 = vsel %vm82_vm0, %v609_v7, 0.0 }
 0x586   :  { %612 = vadd.xlane.f32.xlu0 %v611_v47 }
 0x588   :  { %v606_v49 = vpop.f32.mrf.mxu1 }
 0x589   :  { %v2049_v59 = vadd.f32 %v606_v49, %v1702_v2  ;;  %v644_v2 = vld [vmem:[%s2380_s4 + $0x8] sm:$0xff] }
 0x58a   :  { %667 = vmatpush.msrb.mxu1 %v644_v2 }
 0x58b   :  { %v610_v63 = vmul.f32 %v2049_v59, %v2049_v59 }
 0x58c   :  { %668 = vmatpush.msrb.mxu1 %v643_v26  ;;  %v1429_v26 = vld [vmem:[%s2371_s1 + $0x38] sm:$0xff] }
 0x58d   :  { %v614_v11 = vsel %vm82_vm0, %v610_v63, 0.0  ;;  %v678_v63 = vld [vmem:[%s2381_s5] sm:$0xff]  ;;  %772 = vmatpush.msrb.mxu3 %v1429_v26 }
 0x58e   :  { %615 = vadd.xlane.f32.xlu1 %v614_v11  ;;  %799 = vmatpush.msra.mxu1 %v1726_v19 }
 0x590   :  { %800 = vmatpush.msra.mxu1 %v1731_v20  ;;  %v683_v20 = vld [vmem:[%s2381_s5 + $0x28] sm:$0xff] }
 0x591   :  { %702 = vmatpush.msra.mxu0 %v683_v20  ;;  %1496 = vmatpush.msrb.mxu2 %v683_v20 }
 0x592   :  { %801 = vmatpush.msra.mxu1 %v1737_v22  ;;  %v682_v22 = vld [vmem:[%s2381_s5 + $0x20] sm:$0xff] }
 0x593   :  { %703 = vmatpush.msra.mxu0 %v682_v22  ;;  %1497 = vmatpush.msrb.mxu2 %v682_v22 }
 0x594   :  { %802 = vmatpush.msra.mxu1 %v1743_v23  ;;  %v681_v23 = vld [vmem:[%s2381_s5 + $0x18] sm:$0xff] }
 0x595   :  { %704 = vmatpush.msra.mxu0 %v681_v23  ;;  %1498 = vmatpush.msrb.mxu2 %v681_v23 }
 0x596   :  { %803 = vmatpush.msra.mxu1 %v1749_v24 }
 0x597   :  { %705 = vmatpush.msra.mxu0 %v680_v39  ;;  %1499 = vmatpush.msrb.mxu2 %v680_v39 }
 0x598   :  { %804 = vmatpush.msra.mxu1 %v1756_v27 }
 0x599   :  { %706 = vmatpush.msra.mxu0 %v679_v62  ;;  %1500 = vmatpush.msrb.mxu2 %v679_v62 }
 0x59a   :  { %805 = vmatpush.msra.mxu1 %v1767_v45 }
 0x59b   :  { %707 = vmatpush.msra.mxu0 %v678_v63  ;;  %1501 = vmatpush.msrb.mxu2 %v678_v63 }
 0x59c   :  { %806 = vmatpush.msra.mxu1 %v1773_v46 }
 0x5f9   :  { %v613_v61 = vpop.xlane.xlu0 %612 }
 0x5fa   :  { %v617_v5 = vmul.f32 %v613_v61, %v1720_v16  ;;  %v1428_v61 = vld [vmem:[%s2371_s1 + $0x30] sm:$0xff] }
 0x5fb   :  { %773 = vmatpush.msrb.mxu3 %v1428_v61 }
 0x5fc   :  { %v619_v19 = vadd.f32 1e-06, %v617_v5 }
 0x5fe   :  { %1559 = vrsqrt.f32 %v619_v19  ;;  %vm627_vm2 = vweird.f32 %v619_v19 }
 0x601   :  { %v616_v24 = vpop.xlane.xlu1 %615 }
 0x602   :  { %v618_v27 = vmul.f32 %v616_v24, %v1720_v16 }
 0x604   :  { %v1560_v45 = vpop.eup %1559  ;;  %v620_v9 = vadd.f32 1e-06, %v618_v27  ;;  %v1426_v27 = vld [vmem:[%s2371_s1 + $0x20] sm:$0xff] }
 0x605   :  { %v622_v42 = vmul.f32 %v1560_v45, %v619_v19  ;;  %vm628_vm1 = vweird.f32 %v1560_v45 }
 0x606   :  { %1561 = vrsqrt.f32 %v620_v9  ;;  %vm629_vm3 = vmor %vm627_vm2, %vm628_vm1  ;;  %vm637_vm5 = vweird.f32 %v620_v9 }
 0x607   :  { %v623_v46 = vmul.f32 %v1560_v45, %v622_v42 }
 0x609   :  { %v624_v43 = vmul.f32 0.5, %v623_v46 }
 0x60b   :  { %v625_v52 = vsub.f32 1.5, %v624_v43 }
 0x60c   :  { %v1562_v28 = vpop.eup %1561 }
 0x60d   :  { %v626_v55 = vmul.f32 %v1560_v45, %v625_v52  ;;  %v632_v57 = vmul.f32 %v1562_v28, %v620_v9  ;;  %vm638_vm4 = vweird.f32 %v1562_v28 }
 0x60e   :  { %vm639_vm6 = vmor %vm637_vm5, %vm638_vm4 }
 0x60f   :  { %v630_v34 = vsel %vm629_vm3, %v1560_v45, %v626_v55  ;;  %v633_v60 = vmul.f32 %v1562_v28, %v632_v57 }
 0x610   :  { %v641_v1 = vmul.f32 %v630_v34, %v2043_v4 }
 0x611   :  { %v634_v40 = vmul.f32 0.5, %v633_v60 }
 0x612   :  { %1422 = vmatmul.msk.f32.vlgmr.msrb.gmra.mxu1 %vm82_vm0, %v641_v1 }
 0x613   :  { %v635_v3 = vsub.f32 1.5, %v634_v40 }
 0x615   :  { %v636_v7 = vmul.f32 %v1562_v28, %v635_v3 }
 0x617   :  { %v640_v47 = vsel %vm639_vm6, %v1562_v28, %v636_v7 }
 0x618   :  { %v642_v49 = vmul.f32 %v640_v47, %v2049_v59 }
 0x61a   :  { %1423 = vmatmul.msk.f32.gmra.mxu1 %vm82_vm0, %v642_v49 }
 0x68f   :  { %v670_v11 = vpop.f32.mrf.mxu1 }
 0x690   :  { %v676_v0 = vmax.f32 %v670_v11, 0.0 }
 0x692   :  { %1424 = vmatmul.msk.f32.vlgmr.msra.gmra.mxu0 %vm157_vm8, %v676_v0 }
 0x697   :  { %v673_v56 = vpop.f32.mrf.mxu1 }
 0x698   :  { %v677_v2 = vmax.f32 %v673_v56, 0.0 }
 0x69a   :  { %1425 = vmatmul.msk.f32.vlgmr.msrb.gmra.mxu2 %vm157_vm8, %v677_v2 }
 0x70f   :  { %v709_v5 = vpop.f32.mrf.mxu0 }
 0x710   :  { %v2113_v33 = vadd.f32 %v709_v5, %v2043_v4  ;;  %v1427_v4 = vld [vmem:[%s2371_s1 + $0x28] sm:$0xff] }
 0x711   :  { %774 = vmatpush.msrb.mxu3 %v1427_v4 }
 0x712   :  { %v715_v36 = vmul.f32 %v2113_v33, %v2113_v33 }
 0x713   :  { %775 = vmatpush.msrb.mxu3 %v1426_v27 }
 0x714   :  { %v717_v19 = vsel %vm82_vm0, %v715_v36, 0.0 }
 0x715   :  { %718 = vadd.xlane.f32.xlu0 %v717_v19 }
 0x71d   :  { %v712_v20 = vpop.f32.mrf.mxu2 }
 0x71e   :  { %v2119_v22 = vadd.f32 %v712_v20, %v2049_v59 }
 0x720   :  { %v716_v23 = vmul.f32 %v2119_v22, %v2119_v22 }
 0x722   :  { %v720_v24 = vsel %vm82_vm0, %v716_v23, 0.0 }
 0x723   :  { %721 = vadd.xlane.f32.xlu1 %v720_v24 }
 0x788   :  { %v719_v39 = vpop.xlane.xlu0 %718 }
 0x789   :  { %v723_v59 = vmul.f32 %v719_v39, %v1720_v16 }
 0x78b   :  { %v725_v45 = vadd.f32 1e-06, %v723_v59  ;;  %v1516_v59 = vld [vmem:[%s2373_s2 + $0x1] ss:$0 sm:$0xff] }
 0x78d   :  { %1563 = vrsqrt.f32 %v725_v45  ;;  %vm733_vm9 = vweird.f32 %v725_v45 }
 0x793   :  { %v1564_v9 = vpop.eup %1563 }
 0x794   :  { %v728_v62 = vmul.f32 %v1564_v9, %v725_v45  ;;  %vm734_vm7 = vweird.f32 %v1564_v9 }
 0x795   :  { %vm735_vm10 = vmor %vm733_vm9, %vm734_vm7 }
 0x796   :  { %v729_v42 = vmul.f32 %v1564_v9, %v728_v62  ;;  %v722_v46 = vpop.xlane.xlu1 %721 }
 0x797   :  { %v724_v43 = vmul.f32 %v722_v46, %v1720_v16 }
 0x798   :  { %v730_v52 = vmul.f32 0.5, %v729_v42 }
 0x799   :  { %v726_v28 = vadd.f32 1e-06, %v724_v43 }
 0x79a   :  { %v731_v55 = vsub.f32 1.5, %v730_v52 }
 0x79b   :  { %1565 = vrsqrt.f32 %v726_v28  ;;  %vm743_vm12 = vweird.f32 %v726_v28 }
 0x79c   :  { %v732_v57 = vmul.f32 %v1564_v9, %v731_v55 }
 0x79e   :  { %v736_v34 = vsel %vm735_vm10, %v1564_v9, %v732_v57 }
 0x79f   :  { %v747_v60 = vmul.f32 %v736_v34, %v2113_v33 }
 0x7a1   :  { %v1566_v1 = vpop.eup %1565  ;;  %1430 = vmatmul.msk.f32.vlgmr.msrb.gmra.mxu3 %vm82_vm0, %v747_v60 }
 0x7a2   :  { %v738_v40 = vmul.f32 %v1566_v1, %v726_v28  ;;  %vm744_vm11 = vweird.f32 %v1566_v1 }
 0x7a3   :  { %vm745_vm13 = vmor %vm743_vm12, %vm744_vm11 }
 0x7a4   :  { %v739_v3 = vmul.f32 %v1566_v1, %v738_v40 }
 0x7a6   :  { %v740_v7 = vmul.f32 0.5, %v739_v3 }
 0x7a8   :  { %v741_v47 = vsub.f32 1.5, %v740_v7 }
 0x7aa   :  { %v742_v49 = vmul.f32 %v1566_v1, %v741_v47 }
 0x7ac   :  { %v746_v63 = vsel %vm745_vm13, %v1566_v1, %v742_v49 }
 0x7ad   :  { %v748_v11 = vmul.f32 %v746_v63, %v2119_v22 }
 0x7af   :  { %1431 = vmatmul.msk.f32.gmra.mxu3 %vm82_vm0, %v748_v11 }
 0x824   :  { %v2136_v0 = vpop.f32.mrf.mxu3 }
 0x825   :  { %v783_v56 = vmul.f32 %v2136_v0, %v2136_v0 }
 0x827   :  { %1432 = vmatmul.msk.f32.vlgmr.msra.gmra.mxu1 %vm157_vm8, %v783_v56 }
 0x832   :  { %v2141_v2 = vpop.f32.mrf.mxu3 }
 0x833   :  { %v784_v26 = vmul.f32 %v2141_v2, %v2141_v2 }
 0x835   :  { %1433 = vmatmul.msk.f32.gmra.mxu1 %vm157_vm8, %v784_v26 }
 0x8a4   :  { %v808_v61 = vpop.f32.mrf.mxu1 }
 0x8a5   :  { %v809_v5 = vadd.f32 1e-06, %v808_v61 }
 0x8a7   :  { %1567 = vrsqrt.f32 %v809_v5  ;;  %vm820_vm1 = vweird.f32 %v809_v5 }
 0x8ad   :  { %v1568_v36 = vpop.eup %1567 }
 0x8ae   :  { %v815_v19 = vmul.f32 %v1568_v36, %v809_v5  ;;  %vm821_vm14 = vweird.f32 %v1568_v36 }
 0x8af   :  { %vm822_vm2 = vmor %vm820_vm1, %vm821_vm14 }
 0x8b0   :  { %v816_v20 = vmul.f32 %v1568_v36, %v815_v19 }
 0x8b2   :  { %v817_v23 = vmul.f32 0.5, %v816_v20  ;;  %v811_v24 = vpop.f32.mrf.mxu1  ;;  %v1445_v20 = vld [vmem:[%s2376_s6 + $0x58] sm:$0xff] }
 0x8b3   :  { %v812_v4 = vadd.f32 1e-06, %v811_v24 }
 0x8b4   :  { %v818_v27 = vsub.f32 1.5, %v817_v23 }
 0x8b5   :  { %1569 = vrsqrt.f32 %v812_v4  ;;  %vm830_vm4 = vweird.f32 %v812_v4 }
 0x8b6   :  { %v819_v39 = vmul.f32 %v1568_v36, %v818_v27  ;;  %v1446_v27 = vld [vmem:[%s2376_s6 + $0x60] sm:$0xff] }
 0x8b8   :  { %v823_v45 = vsel %vm822_vm2, %v1568_v36, %v819_v39 }
 0x8b9   :  { %v834_v9 = vmul.f32 %v823_v45, %v2136_v0 }
 0x8bb   :  { %v1570_v62 = vpop.eup %1569  ;;  %v838_v42 = vmul.f32 %v1516_v59, %v834_v9  ;;  %v1447_v9 = vld [vmem:[%s2376_s6 + $0x68] sm:$0xff] }
 0x8bc   :  { %v825_v46 = vmul.f32 %v1570_v62, %v812_v4  ;;  %vm831_vm3 = vweird.f32 %v1570_v62 }
 0x8bd   :  { %900 = vrot.lane.b32.xlu1 %v838_v42, %s1620_s18  ;;  %vm832_vm5 = vmor %vm830_vm4, %vm831_vm3 }
 0x8be   :  { %v826_v43 = vmul.f32 %v1570_v62, %v825_v46 }
 0x8c0   :  { %v827_v52 = vmul.f32 0.5, %v826_v43  ;;  %v1448_v43 = vld [vmem:[%s2376_s6 + $0x70] sm:$0xff] }
 0x8c2   :  { %v828_v28 = vsub.f32 1.5, %v827_v52 }
 0x8c4   :  { %v829_v55 = vmul.f32 %v1570_v62, %v828_v28 }
 0x8c6   :  { %v833_v57 = vsel %vm832_vm5, %v1570_v62, %v829_v55  ;;  %v1510_v55 = vpack.i.bf16 %v2136_v0, %v2141_v2 }
 0x8c7   :  { %v835_v34 = vmul.f32 %v833_v57, %v2141_v2 }
 0x8c9   :  { %v839_v60 = vmul.f32 %v1516_v59, %v835_v34  ;;  %v1449_v34 = vld [vmem:[%s2376_s6 + $0x78] sm:$0xff] }
 0x8cb   :  { %902 = vrot.lane.b32.xlu0 %v839_v60, %s1620_s18  ;;  %854 = vmatpush.msra.mxu2 %v839_v60 }
 0x8cd   :  { %855 = vmatpush.msra.mxu2 %v838_v42 }
 0x8ce   :  { %1434 = vmatmul.msk.f32.vlgmr.msra.gmra.mxu2 %vm213_vm15, %v1795_v12 }
 0x8d6   :  { %1435 = vmatmul.msk.f32.gmra.mxu2 %vm213_vm15, %v1803_v13 }
 0x8de   :  { %1436 = vmatmul.msk.f32.gmra.mxu2 %vm213_vm15, %v1810_v14 }
 0x8e6   :  { %1437 = vmatmul.msk.f32.gmra.mxu2 %vm213_vm15, %v1817_v15 }
 0x8ee   :  { %1438 = vmatmul.msk.f32.gmra.mxu2 %vm213_vm15, %v1824_v17 }
 0x8f6   :  { %1439 = vmatmul.msk.f32.gmra.mxu2 %vm213_vm15, %v1831_v18 }
 0x8fe   :  { %1440 = vmatmul.msk.f32.gmra.mxu2 %vm213_vm15, %v1838_v21 }
 0x906   :  { %1441 = vmatmul.msk.f32.gmra.mxu2 %vm213_vm15, %v1845_v25 }
 0x92f   :  { %v901_v13 = vpop.permute.xlu1 %900 }
 0x93d   :  { %v903_v12 = vpop.permute.xlu0 %902 }
 0x93e   :  { %1450 = vmatpush.xpose.msk.msrb.mxu0 %vm82_vm0, %v903_v12 }
 0x942   :  { %1451 = vmatpush.xpose.msk.msrb.mxu0 %vm82_vm0, %v901_v13 }
 0x951   :  { %v857_v14 = vpop.f32.mrf.mxu2 }
 0x952   :  { %v881_v15 = vmul.f32 %v857_v14, %v1854_v29 }
 0x954   :  { %1452 = vmatmul.msk.f32.vlgmr.msrb.gmra.mxu0 %vm82_vm0, %v881_v15 }
 0x959   :  { %v860_v17 = vpop.f32.mrf.mxu2 }
 0x95a   :  { %v882_v18 = vmul.f32 %v860_v17, %v1861_v32 }
 0x95c   :  { %1453 = vmatmul.msk.f32.gmra.mxu0 %vm82_vm0, %v882_v18 }
 0x961   :  { %v863_v21 = vpop.f32.mrf.mxu2 }
 0x962   :  { %v883_v1 = vmul.f32 %v863_v21, %v1868_v35 }
 0x964   :  { %1454 = vmatmul.msk.f32.gmra.mxu0 %vm82_vm0, %v883_v1 }
 0x969   :  { %v866_v25 = vpop.f32.mrf.mxu2 }
 0x96a   :  { %v884_v40 = vmul.f32 %v866_v25, %v1875_v38 }
 0x96c   :  { %1455 = vmatmul.msk.f32.gmra.mxu0 %vm82_vm0, %v884_v40 }
 0x971   :  { %v869_v3 = vpop.f32.mrf.mxu2 }
 0x972   :  { %v885_v29 = vmul.f32 %v869_v3, %v1882_v41  ;;  %v1442_v41 = vld [vmem:[%s2376_s6 + $0x40] sm:$0xff] }
 0x974   :  { %1456 = vmatmul.msk.f32.gmra.mxu0 %vm82_vm0, %v885_v29 }
 0x979   :  { %v872_v7 = vpop.f32.mrf.mxu2 }
 0x97a   :  { %v886_v32 = vmul.f32 %v872_v7, %v1889_v44 }
 0x97c   :  { %1457 = vmatmul.msk.f32.gmra.mxu0 %vm82_vm0, %v886_v32 }
 0x981   :  { %v875_v47 = vpop.f32.mrf.mxu2 }
 0x982   :  { %v887_v35 = vmul.f32 %v875_v47, %v1896_v51  ;;  %v1443_v51 = vld [vmem:[%s2376_s6 + $0x48] sm:$0xff] }
 0x984   :  { %1458 = vmatmul.msk.f32.gmra.mxu0 %vm82_vm0, %v887_v35 }
 0x989   :  { %v878_v49 = vpop.f32.mrf.mxu2 }
 0x98a   :  { %v888_v38 = vmul.f32 %v878_v49, %v1903_v54  ;;  %v1444_v54 = vld [vmem:[%s2376_s6 + $0x50] sm:$0xff] }
 0x98c   :  { %1459 = vmatmul.msk.f32.gmra.mxu0 %vm82_vm0, %v888_v38 }
 0x9d1   :  { %v949_v63 = vpop.f32.mrf.mxu0 }
 0x9d2   :  { %v950_v11 = vadd.f32 %v1442_v41, %v949_v63 }
 0x9d4   :  { %v973_v44 = vsel %vm213_vm15, %v950_v11, -inf }
 0x9d5   :  { %974 = vmax.xlane.f32.xlu2 %v973_v44 }
 0x9d9   :  { %v952_v56 = vpop.f32.mrf.mxu0 }
 0x9da   :  { %v953_v26 = vadd.f32 %v1443_v51, %v952_v56 }
 0x9dc   :  { %v976_v61 = vsel %vm213_vm15, %v953_v26, -inf }
 0x9dd   :  { %977 = vmax.xlane.f32.xlu0 %v976_v61 }
 0x9e1   :  { %v955_v5 = vpop.f32.mrf.mxu0 }
 0x9e2   :  { %v956_v36 = vadd.f32 %v1444_v54, %v955_v5 }
 0x9e4   :  { %v979_v19 = vsel %vm213_vm15, %v956_v36, -inf }
 0x9e5   :  { %980 = vmax.xlane.f32.xlu2 %v979_v19 }
 0x9e9   :  { %v958_v23 = vpop.f32.mrf.mxu0 }
 0x9ea   :  { %v959_v24 = vadd.f32 %v1445_v20, %v958_v23 }
 0x9ec   :  { %v982_v4 = vsel %vm213_vm15, %v959_v24, -inf }
 0x9ed   :  { %983 = vmax.xlane.f32.xlu1 %v982_v4 }
 0x9f1   :  { %v961_v39 = vpop.f32.mrf.mxu0 }
 0x9f2   :  { %v962_v59 = vadd.f32 %v1446_v27, %v961_v39 }
 0x9f4   :  { %v985_v45 = vsel %vm213_vm15, %v962_v59, -inf }
 0x9f5   :  { %986 = vmax.xlane.f32.xlu2 %v985_v45 }
 0x9f9   :  { %v964_v62 = vpop.f32.mrf.mxu0 }
 0x9fa   :  { %v965_v42 = vadd.f32 %v1447_v9, %v964_v62 }
 0x9fc   :  { %v988_v46 = vsel %vm213_vm15, %v965_v42, -inf }
 0x9fd   :  { %989 = vmax.xlane.f32.xlu2 %v988_v46 }
 0xa01   :  { %v967_v52 = vpop.f32.mrf.mxu0 }
 0xa02   :  { %v968_v28 = vadd.f32 %v1448_v43, %v967_v52 }
 0xa04   :  { %v991_v57 = vsel %vm213_vm15, %v968_v28, -inf }
 0xa05   :  { %992 = vmax.xlane.f32.xlu2 %v991_v57 }
 0xa06   :  { %1511 = vrot.lane.b32.xlu1 %v1510_v55, %s1621_s29 }
 0xa09   :  { %v970_v60 = vpop.f32.mrf.mxu0 }
 0xa0a   :  { %v971_v12 = vadd.f32 %v1449_v34, %v970_v60 }
 0xa0c   :  { %v994_v13 = vsel %vm213_vm15, %v971_v12, -inf }
 0xa0d   :  { %995 = vmax.xlane.f32.xlu0 %v994_v13 }
 0xa48   :  { %v975_v14 = vpop.xlane.xlu2 %974 }
 0xa49   :  { %v997_v15 = vsub.f32 %v950_v11, %v975_v14 }
 0xa4b   :  { %v1005_v17 = vmul.f32 1.442695, %v997_v15 }
 0xa4d   :  { %1571 = vpow2.f32 %v1005_v17 }
 0xa50   :  { %v978_v18 = vpop.xlane.xlu0 %977 }
 0xa51   :  { %v998_v0 = vsub.f32 %v953_v26, %v978_v18 }
 0xa53   :  { %v1572_v2 = vpop.eup %1571  ;;  %v1007_v21 = vmul.f32 1.442695, %v998_v0 }
 0xa54   :  { %v1021_v1 = vsel %vm213_vm15, %v1572_v2, 0.0 }
 0xa55   :  { %1573 = vpow2.f32 %v1007_v21  ;;  %1022 = vadd.xlane.f32.xlu2 %v1021_v1 }
 0xa58   :  { %v981_v25 = vpop.xlane.xlu2 %980 }
 0xa59   :  { %v999_v40 = vsub.f32 %v956_v36, %v981_v25 }
 0xa5b   :  { %v1574_v3 = vpop.eup %1573  ;;  %v1009_v29 = vmul.f32 1.442695, %v999_v40 }
 0xa5c   :  { %v1024_v7 = vsel %vm213_vm15, %v1574_v3, 0.0 }
 0xa5d   :  { %1575 = vpow2.f32 %v1009_v29  ;;  %1025 = vadd.xlane.f32.xlu2 %v1024_v7 }
 0xa60   :  { %v984_v32 = vpop.xlane.xlu1 %983 }
 0xa61   :  { %v1000_v47 = vsub.f32 %v959_v24, %v984_v32 }
 0xa63   :  { %v1576_v35 = vpop.eup %1575  ;;  %v1011_v49 = vmul.f32 1.442695, %v1000_v47 }
 0xa64   :  { %v1027_v38 = vsel %vm213_vm15, %v1576_v35, 0.0 }
 0xa65   :  { %1577 = vpow2.f32 %v1011_v49  ;;  %1028 = vadd.xlane.f32.xlu0 %v1027_v38 }
 0xa68   :  { %v987_v41 = vpop.xlane.xlu2 %986 }
 0xa69   :  { %v1001_v63 = vsub.f32 %v962_v59, %v987_v41 }
 0xa6b   :  { %v1578_v11 = vpop.eup %1577  ;;  %v1013_v44 = vmul.f32 1.442695, %v1001_v63 }
 0xa6c   :  { %v1030_v51 = vsel %vm213_vm15, %v1578_v11, 0.0 }
 0xa6d   :  { %1579 = vpow2.f32 %v1013_v44  ;;  %1031 = vadd.xlane.f32.xlu2 %v1030_v51 }
 0xa70   :  { %v990_v56 = vpop.xlane.xlu2 %989 }
 0xa71   :  { %v1002_v26 = vsub.f32 %v965_v42, %v990_v56 }
 0xa73   :  { %v1580_v61 = vpop.eup %1579  ;;  %v1015_v54 = vmul.f32 1.442695, %v1002_v26 }
 0xa74   :  { %v1033_v5 = vsel %vm213_vm15, %v1580_v61, 0.0 }
 0xa75   :  { %1581 = vpow2.f32 %v1015_v54  ;;  %1034 = vadd.xlane.f32.xlu0 %v1033_v5  ;;  %v1612_v5 = vld [vmem:[%s2375_s10 + $0x30] sm:$0xff] }
 0xa78   :  { %v1512_v36 = vpop.permute.xlu1 %1511  ;;  %v993_v19 = vpop.xlane.xlu2 %992 }
 0xa79   :  { %v1513_v20 = vunpack.i.l.bf16 %v1512_v36  ;;  %v1003_v23 = vsub.f32 %v968_v28, %v993_v19  ;;  %v1514_v4 = vunpack.i.h.bf16 %v1512_v36  ;;  %v1613_v36 = vld [vmem:[%s2375_s10 + $0x28] sm:$0xff] }
 0xa7b   :  { %v1582_v24 = vpop.eup %1581  ;;  %v1017_v27 = vmul.f32 1.442695, %v1003_v23  ;;  %1115 = vmatpush.msra.mxu3 %v1513_v20  ;;  %v1614_v20 = vld [vmem:[%s2375_s10 + $0x20] sm:$0xff] }
 0xa7c   :  { %v1036_v39 = vsel %vm213_vm15, %v1582_v24, 0.0 }
 0xa7d   :  { %1583 = vpow2.f32 %v1017_v27  ;;  %1116 = vmatpush.msra.mxu3 %v1514_v4  ;;  %1037 = vadd.xlane.f32.xlu2 %v1036_v39  ;;  %v1616_v27 = vld [vmem:[%s2375_s10 + $0x10] sm:$0xff] }
 0xa80   :  { %v996_v59 = vpop.xlane.xlu0 %995 }
 0xa81   :  { %v1004_v45 = vsub.f32 %v971_v12, %v996_v59  ;;  %v1617_v59 = vld [vmem:[%s2375_s10 + $0x8] sm:$0xff] }
 0xa83   :  { %v1584_v9 = vpop.eup %1583  ;;  %v1019_v62 = vmul.f32 1.442695, %v1004_v45 }
 0xa84   :  { %v1039_v42 = vsel %vm213_vm15, %v1584_v9, 0.0 }
 0xa85   :  { %1585 = vpow2.f32 %v1019_v62  ;;  %1040 = vadd.xlane.f32.xlu0 %v1039_v42  ;;  %v1473_v42 = vld [vmem:[%s2379_s3 + $0x38] sm:$0xff] }
 0xa8b   :  { %v1586_v46 = vpop.eup %1585 }
 0xa8c   :  { %v1042_v43 = vsel %vm213_vm15, %v1586_v46, 0.0 }
 0xa8d   :  { %1043 = vadd.xlane.f32.xlu2 %v1042_v43  ;;  %v1471_v43 = vld [vmem:[%s2379_s3 + $0x28] sm:$0xff] }
 0xac8   :  { %v1023_v52 = vpop.xlane.xlu2 %1022 }
 0xac9   :  { %1587 = vrcp.f32 %v1023_v52  ;;  %v1470_v52 = vld [vmem:[%s2379_s3 + $0x20] sm:$0xff] }
 0xacf   :  { %v1588_v28 = vpop.eup %1587 }
 0xad0   :  { %v1053_v55 = vmul.f32 %v1588_v28, %v1572_v2  ;;  %v1026_v57 = vpop.xlane.xlu2 %1025 }
 0xad1   :  { %1589 = vrcp.f32 %v1026_v57 }
 0xad2   :  { %v1061_v34 = vmul.f32 %v1053_v55, %v1953_v50 }
 0xad4   :  { %1460 = vmatmul.msk.f32.vlgmr.msra.gmra.mxu3 %vm213_vm15, %v1061_v34 }
 0xad7   :  { %v1590_v60 = vpop.eup %1589 }
 0xad8   :  { %v1029_v12 = vpop.xlane.xlu0 %1028  ;;  %v1054_v13 = vmul.f32 %v1590_v60, %v1574_v3 }
 0xad9   :  { %1591 = vrcp.f32 %v1029_v12 }
 0xada   :  { %v1062_v14 = vmul.f32 %v1054_v13, %v1960_v10 }
 0xadc   :  { %1461 = vmatmul.msk.f32.gmra.mxu3 %vm213_vm15, %v1062_v14 }
 0xadf   :  { %v1592_v15 = vpop.eup %1591 }
 0xae0   :  { %v1032_v17 = vpop.xlane.xlu2 %1031  ;;  %v1055_v18 = vmul.f32 %v1592_v15, %v1576_v35  ;;  %v1478_v15 = vld [vmem:[%s2380_s4 + $0x30] sm:$0xff] }
 0xae1   :  { %1593 = vrcp.f32 %v1032_v17  ;;  %v1476_v17 = vld [vmem:[%s2380_s4 + $0x20] sm:$0xff] }
 0xae2   :  { %v1063_v0 = vmul.f32 %v1055_v18, %v1967_v31 }
 0xae4   :  { %1462 = vmatmul.msk.f32.gmra.mxu3 %vm213_vm15, %v1063_v0 }
 0xae7   :  { %v1594_v2 = vpop.eup %1593 }
 0xae8   :  { %v1035_v50 = vpop.xlane.xlu0 %1034  ;;  %v1056_v21 = vmul.f32 %v1594_v2, %v1578_v11  ;;  %v1489_v2 = vld [vmem:[%s2381_s5 + $0x78] sm:$0xff] }
 0xae9   :  { %1595 = vrcp.f32 %v1035_v50  ;;  %v1488_v50 = vld [vmem:[%s2381_s5 + $0x70] sm:$0xff] }
 0xaea   :  { %v1064_v1 = vmul.f32 %v1056_v21, %v1974_v6 }
 0xaec   :  { %1463 = vmatmul.msk.f32.gmra.mxu3 %vm213_vm15, %v1064_v1  ;;  %v1487_v1 = vld [vmem:[%s2381_s5 + $0x68] sm:$0xff] }
 0xaef   :  { %v1596_v25 = vpop.eup %1595 }
 0xaf0   :  { %v1038_v10 = vpop.xlane.xlu2 %1037  ;;  %v1057_v40 = vmul.f32 %v1596_v25, %v1580_v61  ;;  %v1486_v25 = vld [vmem:[%s2381_s5 + $0x60] sm:$0xff] }
 0xaf1   :  { %1597 = vrcp.f32 %v1038_v10  ;;  %v1485_v10 = vld [vmem:[%s2381_s5 + $0x58] sm:$0xff] }
 0xaf2   :  { %v1065_v3 = vmul.f32 %v1057_v40, %v1981_v8 }
 0xaf4   :  { %1464 = vmatmul.msk.f32.gmra.mxu3 %vm213_vm15, %v1065_v3 }
 0xaf7   :  { %v1598_v29 = vpop.eup %1597 }
 0xaf8   :  { %v1041_v31 = vpop.xlane.xlu0 %1040  ;;  %v1058_v7 = vmul.f32 %v1598_v29, %v1582_v24  ;;  %v1615_v24 = vld [vmem:[%s2375_s10 + $0x18] sm:$0xff]  ;;  %v1484_v29 = vld [vmem:[%s2381_s5 + $0x50] sm:$0xff] }
 0xaf9   :  { %1599 = vrcp.f32 %v1041_v31 }
 0xafa   :  { %v1066_v32 = vmul.f32 %v1058_v7, %v1988_v30 }
 0xafc   :  { %1465 = vmatmul.msk.f32.gmra.mxu3 %vm213_vm15, %v1066_v32 }
 0xaff   :  { %v1600_v47 = vpop.eup %1599 }
 0xb00   :  { %v1044_v6 = vpop.xlane.xlu2 %1043  ;;  %v1059_v35 = vmul.f32 %v1600_v47, %v1584_v9  ;;  %v1618_v9 = vld [vmem:[%s2375_s10] sm:$0xff] }
 0xb01   :  { %1601 = vrcp.f32 %v1044_v6 }
 0xb02   :  { %v1067_v49 = vmul.f32 %v1059_v35, %v1995_v37  ;;  %v1611_v37 = vld [vmem:[%s2375_s10 + $0x38] sm:$0xff] }
 0xb04   :  { %1466 = vmatmul.msk.f32.gmra.mxu3 %vm213_vm15, %v1067_v49 }
 0xb07   :  { %v1602_v38 = vpop.eup %1601 }
 0xb08   :  { %v1060_v8 = vmul.f32 %v1602_v38, %v1586_v46  ;;  %v1472_v46 = vld [vmem:[%s2379_s3 + $0x30] sm:$0xff] }
 0xb0a   :  { %v1068_v41 = vmul.f32 %v1060_v8, %v2002_v48 }
 0xb0c   :  { %1467 = vmatmul.msk.f32.gmra.mxu3 %vm213_vm15, %v1068_v41 }
 0xb57   :  { %v1118_v63 = vpop.f32.mrf.mxu3 }
 0xb58   :  { %v1142_v62 = vmul.f32 %v1618_v9, %v1118_v63 }
 0xb5f   :  { %v1121_v11 = vpop.f32.mrf.mxu3 }
 0xb60   :  { %v1143_v45 = vmul.f32 %v1617_v59, %v1121_v11 }
 0xb67   :  { %v1124_v44 = vpop.f32.mrf.mxu3 }
 0xb68   :  { %v1144_v39 = vmul.f32 %v1616_v27, %v1124_v44 }
 0xb6f   :  { %v1127_v30 = vpop.f32.mrf.mxu3 }
 0xb70   :  { %v1145_v4 = vmul.f32 %v1615_v24, %v1127_v30 }
 0xb77   :  { %v1130_v51 = vpop.f32.mrf.mxu3 }
 0xb78   :  { %v1146_v23 = vmul.f32 %v1614_v20, %v1130_v51  ;;  %v1351_v20 = vld [vmem:[%s2382_s12 + $0x10] sm:$0xff] }
 0xb7f   :  { %v1133_v56 = vpop.f32.mrf.mxu3 }
 0xb80   :  { %v1147_v19 = vmul.f32 %v1613_v36, %v1133_v56 }
 0xb87   :  { %v1136_v26 = vpop.f32.mrf.mxu3 }
 0xb88   :  { %v1148_v48 = vmul.f32 %v1612_v5, %v1136_v26 }
 0xb8f   :  { %v1139_v61 = vpop.f32.mrf.mxu3 }
 0xb90   :  { %v1149_v54 = vmul.f32 %v1611_v37, %v1139_v61  ;;  %v1483_v61 = vld [vmem:[%s2381_s5 + $0x48] sm:$0xff]  ;;  %v1482_v37 = vld [vmem:[%s2381_s5 + $0x40] sm:$0xff] }
 0xb92   :  { %1158 = vmatpush.msrb.mxu1 %v1149_v54 }
 0xb94   :  { %1159 = vmatpush.msrb.mxu1 %v1148_v48 }
 0xb96   :  { %1160 = vmatpush.msrb.mxu1 %v1147_v19  ;;  %v1352_v19 = vld [vmem:[%s2382_s12 + $0x18] sm:$0xff] }
 0xb97   :  { %1371 = vmatpush.msrb.mxu2 %v1352_v19 }
 0xb98   :  { %1161 = vmatpush.msrb.mxu1 %v1146_v23  ;;  %v1350_v23 = vld [vmem:[%s2382_s12 + $0x8] sm:$0xff] }
 0xb99   :  { %1372 = vmatpush.msrb.mxu2 %v1351_v20 }
 0xb9a   :  { %1162 = vmatpush.msrb.mxu1 %v1145_v4 }
 0xb9b   :  { %1373 = vmatpush.msrb.mxu2 %v1350_v23 }
 0xb9c   :  { %1163 = vmatpush.msrb.mxu1 %v1144_v39 }
 0xb9e   :  { %1164 = vmatpush.msrb.mxu1 %v1143_v45 }
 0xba0   :  { %1165 = vmatpush.msrb.mxu1 %v1142_v62 }
 0xba1   :  { %1468 = vmatmul.msk.f32.vlgmr.msrb.gmra.mxu1 %vm157_vm8, %v2017_v53 }
 0xba2   :  { %1196 = vmatpush.msra.mxu1 %v1473_v42  ;;  %v1349_v42 = vld [vmem:[%s2382_s12] sm:$0xff] }
 0xba3   :  { %1374 = vmatpush.msrb.mxu2 %v1349_v42 }
 0xba4   :  { %1197 = vmatpush.msra.mxu1 %v1472_v46 }
 0xba6   :  { %1198 = vmatpush.msra.mxu1 %v1471_v43 }
 0xba8   :  { %1199 = vmatpush.msra.mxu1 %v1470_v52 }
 0xba9   :  { %1469 = vmatmul.msk.f32.gmra.mxu1 %vm157_vm8, %v2033_v58 }
 0xc1e   :  { %v1167_v53 = vpop.f32.mrf.mxu1 }
 0xc1f   :  { %1474 = vmatmul.msk.f32.vlgmr.msra.gmra.mxu1 %vm82_vm0, %v1167_v53 }
 0xc26   :  { %v1170_v28 = vpop.f32.mrf.mxu1 }
 0xc27   :  { %1475 = vmatmul.msk.f32.gmra.mxu1 %vm82_vm0, %v1170_v28 }
 0xc9c   :  { %v1201_v55 = vpop.f32.mrf.mxu1 }
 0xc9d   :  { %v2289_v57 = vadd.f32 %v1201_v55, %v2113_v33  ;;  %v1479_v33 = vld [vmem:[%s2380_s4 + $0x38] sm:$0xff] }
 0xc9e   :  { %1264 = vmatpush.msrb.mxu1 %v1479_v33 }
 0xc9f   :  { %v1207_v34 = vmul.f32 %v2289_v57, %v2289_v57 }
 0xca0   :  { %1265 = vmatpush.msrb.mxu1 %v1478_v15 }
 0xca1   :  { %v1209_v58 = vsel %vm82_vm0, %v1207_v34, 0.0 }
 0xca2   :  { %1210 = vadd.xlane.f32.xlu0 %v1209_v58 }
 0xca4   :  { %v1204_v60 = vpop.f32.mrf.mxu1 }
 0xca5   :  { %v2295_v12 = vadd.f32 %v1204_v60, %v2119_v22  ;;  %v1477_v22 = vld [vmem:[%s2380_s4 + $0x28] sm:$0xff] }
 0xca6   :  { %1266 = vmatpush.msrb.mxu1 %v1477_v22 }
 0xca7   :  { %v1208_v13 = vmul.f32 %v2295_v12, %v2295_v12 }
 0xca8   :  { %1267 = vmatpush.msrb.mxu1 %v1476_v17 }
 0xca9   :  { %v1212_v14 = vsel %vm82_vm0, %v1208_v13, 0.0 }
 0xcaa   :  { %1213 = vadd.xlane.f32.xlu1 %v1212_v14  ;;  %1300 = vmatpush.msra.mxu1 %v1489_v2 }
 0xcac   :  { %1301 = vmatpush.msra.mxu1 %v1488_v50 }
 0xcae   :  { %1302 = vmatpush.msra.mxu1 %v1487_v1 }
 0xcb0   :  { %1303 = vmatpush.msra.mxu1 %v1486_v25 }
 0xcb2   :  { %1304 = vmatpush.msra.mxu1 %v1485_v10 }
 0xcb4   :  { %1305 = vmatpush.msra.mxu1 %v1484_v29 }
 0xcb6   :  { %1306 = vmatpush.msra.mxu1 %v1483_v61 }
 0xcb8   :  { %1307 = vmatpush.msra.mxu1 %v1482_v37 }
 0xd15   :  { %v1211_v18 = vpop.xlane.xlu0 %1210 }
 0xd16   :  { %v1215_v0 = vmul.f32 %v1211_v18, %v1720_v16 }
 0xd18   :  { %v1217_v21 = vadd.f32 1e-06, %v1215_v0 }
 0xd1a   :  { %1603 = vrsqrt.f32 %v1217_v21  ;;  %vm1225_vm6 = vweird.f32 %v1217_v21 }
 0xd1d   :  { %v1214_v40 = vpop.xlane.xlu1 %1213 }
 0xd1e   :  { %v1216_v3 = vmul.f32 %v1214_v40, %v1720_v16 }
 0xd20   :  { %v1604_v31 = vpop.eup %1603  ;;  %v1218_v7 = vadd.f32 1e-06, %v1216_v3 }
 0xd21   :  { %v1220_v32 = vmul.f32 %v1604_v31, %v1217_v21  ;;  %vm1226_vm15 = vweird.f32 %v1604_v31 }
 0xd22   :  { %1605 = vrsqrt.f32 %v1218_v7  ;;  %vm1227_vm7 = vmor %vm1225_vm6, %vm1226_vm15  ;;  %vm1235_vm10 = vweird.f32 %v1218_v7 }
 0xd23   :  { %v1221_v47 = vmul.f32 %v1604_v31, %v1220_v32 }
 0xd25   :  { %v1222_v6 = vmul.f32 0.5, %v1221_v47 }
 0xd27   :  { %v1223_v35 = vsub.f32 1.5, %v1222_v6 }
 0xd28   :  { %v1606_v49 = vpop.eup %1605 }
 0xd29   :  { %v1224_v38 = vmul.f32 %v1604_v31, %v1223_v35  ;;  %v1230_v8 = vmul.f32 %v1606_v49, %v1218_v7  ;;  %vm1236_vm9 = vweird.f32 %v1606_v49 }
 0xd2a   :  { %vm1237_vm11 = vmor %vm1235_vm10, %vm1236_vm9 }
 0xd2b   :  { %v1228_v41 = vsel %vm1227_vm7, %v1604_v31, %v1224_v38  ;;  %v1231_v63 = vmul.f32 %v1606_v49, %v1230_v8 }
 0xd2c   :  { %v1239_v11 = vmul.f32 %v1228_v41, %v2289_v57 }
 0xd2d   :  { %v1232_v44 = vmul.f32 0.5, %v1231_v63 }
 0xd2e   :  { %1480 = vmatmul.msk.f32.vlgmr.msrb.gmra.mxu1 %vm82_vm0, %v1239_v11 }
 0xd2f   :  { %v1233_v30 = vsub.f32 1.5, %v1232_v44 }
 0xd31   :  { %v1234_v51 = vmul.f32 %v1606_v49, %v1233_v30 }
 0xd33   :  { %v1238_v56 = vsel %vm1237_vm11, %v1606_v49, %v1234_v51 }
 0xd34   :  { %v1240_v26 = vmul.f32 %v1238_v56, %v2295_v12 }
 0xd36   :  { %1481 = vmatmul.msk.f32.gmra.mxu1 %vm82_vm0, %v1240_v26 }
 0xdab   :  { %v1269_v54 = vpop.f32.mrf.mxu1 }
 0xdac   :  { %v1275_v5 = vmax.f32 %v1269_v54, 0.0 }
 0xdae   :  { %1490 = vmatmul.msk.f32.vlgmr.msra.gmra.mxu1 %vm157_vm8, %v1275_v5 }
 0xdb3   :  { %v1272_v48 = vpop.f32.mrf.mxu1 }
 0xdb4   :  { %v1276_v36 = vmax.f32 %v1272_v48, 0.0 }
 0xdb6   :  { %1491 = vmatmul.msk.f32.gmra.mxu1 %vm157_vm8, %v1276_v36 }
 0xe2b   :  { %v1309_v24 = vpop.f32.mrf.mxu1 }
 0xe2c   :  { %v1310_v4 = vadd.f32 %v1309_v24, %v2289_v57 }
 0xe2e   :  { %v1315_v27 = vmul.f32 %v1310_v4, %v1310_v4 }
 0xe30   :  { %v1317_v39 = vsel %vm82_vm0, %v1315_v27, 0.0 }
 0xe31   :  { %1318 = vadd.xlane.f32.xlu2 %v1317_v39 }
 0xe33   :  { %v1312_v59 = vpop.f32.mrf.mxu1 }
 0xe34   :  { %v1313_v45 = vadd.f32 %v1312_v59, %v2295_v12 }
 0xe36   :  { %v1316_v9 = vmul.f32 %v1313_v45, %v1313_v45 }
 0xe38   :  { %v1320_v62 = vsel %vm82_vm0, %v1316_v9, 0.0 }
 0xe39   :  { %1321 = vadd.xlane.f32.xlu0 %v1320_v62 }
 0xea4   :  { %v1319_v46 = vpop.xlane.xlu2 %1318 }
 0xea5   :  { %v1323_v43 = vmul.f32 %v1319_v46, %v1720_v16 }
 0xea7   :  { %v1325_v52 = vadd.f32 1e-06, %v1323_v43 }
 0xea9   :  { %1607 = vrsqrt.f32 %v1325_v52  ;;  %vm1333_vm12 = vweird.f32 %v1325_v52 }
 0xeac   :  { %v1322_v53 = vpop.xlane.xlu0 %1321 }
 0xead   :  { %v1324_v28 = vmul.f32 %v1322_v53, %v1720_v16 }
 0xeaf   :  { %v1608_v55 = vpop.eup %1607  ;;  %v1326_v57 = vadd.f32 1e-06, %v1324_v28 }
 0xeb0   :  { %v1328_v34 = vmul.f32 %v1608_v55, %v1325_v52  ;;  %vm1334_vm8 = vweird.f32 %v1608_v55 }
 0xeb1   :  { %1609 = vrsqrt.f32 %v1326_v57  ;;  %vm1335_vm13 = vmor %vm1333_vm12, %vm1334_vm8  ;;  %vm1343_vm1 = vweird.f32 %v1326_v57 }
 0xeb2   :  { %v1329_v58 = vmul.f32 %v1608_v55, %v1328_v34 }
 0xeb4   :  { %v1330_v60 = vmul.f32 0.5, %v1329_v58 }
 0xeb6   :  { %v1331_v12 = vsub.f32 1.5, %v1330_v60 }
 0xeb7   :  { %v1610_v13 = vpop.eup %1609 }
 0xeb8   :  { %v1332_v14 = vmul.f32 %v1608_v55, %v1331_v12  ;;  %v1338_v33 = vmul.f32 %v1610_v13, %v1326_v57  ;;  %vm1344_vm14 = vweird.f32 %v1610_v13 }
 0xeb9   :  { %vm1345_vm2 = vmor %vm1343_vm1, %vm1344_vm14 }
 0xeba   :  { %v1336_v15 = vsel %vm1335_vm13, %v1608_v55, %v1332_v14  ;;  %v1339_v22 = vmul.f32 %v1610_v13, %v1338_v33 }
 0xebb   :  { %v1347_v17 = vmul.f32 %v1336_v15, %v1310_v4 }
 0xebc   :  { %v1340_v18 = vmul.f32 0.5, %v1339_v22 }
 0xebd   :  { %1492 = vmatmul.msk.f32.vlgmr.msrb.gmra.mxu2 %vm82_vm0, %v1347_v17 }
 0xebe   :  { %v1341_v16 = vsub.f32 1.5, %v1340_v18 }
 0xec0   :  { %v1342_v0 = vmul.f32 %v1610_v13, %v1341_v16 }
 0xec2   :  { %v1346_v2 = vsel %vm1345_vm2, %v1610_v13, %v1342_v0 }
 0xec3   :  { %v1348_v50 = vmul.f32 %v1346_v2, %v1313_v45 }
 0xec5   :  { %1493 = vmatmul.msk.f32.gmra.mxu2 %vm82_vm0, %v1348_v50 }
 0xf40   :  { %v1376_v21 = vpop.f32.mrf.mxu2 }
 0xf41   :  { %1382 = vst [vmem:[%s2383_s13] sm:$0xff] %v1376_v21 }
 0xf48   :  { %v1379_v1 = vpop.f32.mrf.mxu2 }
 0xf49   :  { %1383 = vst [vmem:[%s2383_s13 + $0x8] sm:$0xff] %v1379_v1 }

</bundles_post_ra>
